<compile_context>
chip_gen: v5e
topology: v5e:2x2
jax: 0.10.0
libtpu: 0.0.40
codegen_flags: <defaults>
</compile_context>

<pallas_src>
import math

import jax
import jax.numpy as jnp
from jax import lax
from jax.experimental import pallas as pl
from jax.experimental.pallas import tpu as pltpu

# ----------------------------- model config (small, synthetic) ----------------
B = 2          # batch
S = 8          # context length
D = 32         # transformer width
H = 4          # attention heads
HD = D // H    # head dim
FF = 4 * D     # MLP hidden
L = 2          # transformer layers
VOCAB = 64     # vocab size (highest id acts as EOT, CLIP convention)
OUT_DIM = 64   # text_projection output dim
EPS = 1e-5
NEG_INF = -1e30
_SCALE = 1.0 / math.sqrt(HD)

BS = B * S          # folded batch*seq rows (sublane axis)
BHS = B * H * S     # packed (batch, head, key) column axis


# ----------------------------- kernel helpers ---------------------------------
def _layernorm(x, g, b):
    # f32 mean/var math; casts to bf16 happen only at MXU inputs.
    mu = jnp.mean(x, axis=-1, keepdims=True)
    var = jnp.mean((x - mu) ** 2, axis=-1, keepdims=True)
    return (x - mu) * lax.rsqrt(var + EPS) * g + b


# ----------------------------- fused Pallas kernel ----------------------------
def clip_fused_kernel(
    x0_ref,                        # [BS, D]    f32   token+pos embedding (batch folded)
    pool_ref,                      # [B, BS]    f32   one-hot EOT row selector
    bias_ref,                      # [BS, BHS]  f32   causal + batch block-diag additive mask
    expand_ref,                    # [BHS, BS]  bf16  0/1 key/value row replication operator
    hmask_ref,                     # [BHS, D]   bf16  0/1 head-of-row == head-of-col
    seg_ref,                       # [BHS, H]   bf16  0/1 head indicator (softmax denom)
    colmap_ref,                    # [H, D]     bf16  0/1 head -> feature columns
    vecs_ref,                      # [L, 8, D]  f32   rows: ln1_g ln1_b ln2_g ln2_b bo b2 0 0
    wqkv_ref,                      # [L, D, 3D] bf16  (Q columns pre-scaled by 1/sqrt(HD))
    bqkv_ref,                      # [L, 1, 3D] f32   (Q part pre-scaled)
    wo_ref,                        # [L, D, D]  bf16
    w1_ref,                        # [L, D, FF] bf16
    b1_ref,                        # [L, 1, FF] f32
    w2_ref,                        # [L, FF, D] bf16
    lnf_ref,                       # [2, D]     f32   rows: ln_final_g, ln_final_b
    proj_ref,                      # [D, OUT_DIM] bf16
    out_ref,                       # [B, OUT_DIM] f32
):
    # Layer-invariant constants: loaded once, reused by every layer iteration.
    bias = bias_ref[...]
    expand = expand_ref[...]
    hmask = hmask_ref[...]
    seg = seg_ref[...]
    colmap = colmap_ref[...]

    def layer(l, x):                                    # x: [BS, D] f32 residual stream
        vecs = vecs_ref[l]                              # [8, D]
        ln1_g, ln1_b = vecs[0:1, :], vecs[1:2, :]
        ln2_g, ln2_b = vecs[2:3, :], vecs[3:4, :]
        bo, b2 = vecs[4:5, :], vecs[5:6, :]

        # ---------------- multi-head causal self-attention -----------------
        h1 = _layernorm(x, ln1_g, ln1_b)
        qkv = jnp.dot(h1.astype(jnp.bfloat16), wqkv_ref[l],
                      preferred_element_type=jnp.float32) + bqkv_ref[l]     # [BS, 3D]
        q = qkv[:, :D].astype(jnp.bfloat16)             # already 1/sqrt(HD)-scaled
        k = qkv[:, D:2 * D].astype(jnp.bfloat16)
        v = qkv[:, 2 * D:].astype(jnp.bfloat16)

        # Replicate key/value rows into the packed (batch, head, key) row space with a
        # precomputed 0/1 matmul (MXU), then zero cross-head feature columns (1 bf16 mul).
        k_blk = (jnp.dot(expand, k, preferred_element_type=jnp.float32)
                 .astype(jnp.bfloat16) * hmask)                             # [BHS, D]
        v_blk = (jnp.dot(expand, v, preferred_element_type=jnp.float32)
                 .astype(jnp.bfloat16) * hmask)                             # [BHS, D]

        # scores[r, n] = <q_head(r), k_head(n)> for same head; bias enforces causal +
        # same-batch (block-diagonal over folded batch).
        s = lax.dot_general(q, k_blk, (((1,), (1,)), ((), ())),
                            preferred_element_type=jnp.float32) + bias      # [BS, BHS]

        # Shared per-query max is an exact softmax stabilizer (shift-invariance);
        # per-head max would be safer against underflow for real checkpoints.
        m = jnp.max(s, axis=-1, keepdims=True)
        p = jnp.exp(s - m).astype(jnp.bfloat16)          # masked entries -> 0; one bf16 copy

        o_un = jnp.dot(p, v_blk, preferred_element_type=jnp.float32)        # [BS, D]
        denom = jnp.dot(p, seg, preferred_element_type=jnp.float32)         # [BS, H]
        denom_cols = jnp.dot(denom.astype(jnp.bfloat16), colmap,
                             preferred_element_type=jnp.float32)            # [BS, D]
        attn = o_un * pl.reciprocal(denom_cols, approx=True)

        x = x + jnp.dot(attn.astype(jnp.bfloat16), wo_ref[l],
                        preferred_element_type=jnp.float32) + bo

        # ---------------- MLP ----------------------------------------------
        h2 = _layernorm(x, ln2_g, ln2_b)
        f = jnp.dot(h2.astype(jnp.bfloat16), w1_ref[l],
                    preferred_element_type=jnp.float32) + b1_ref[l]          # [BS, FF]
        f = jax.nn.gelu(f, approximate=True)             # tanh approx (EUP)
        x = x + jnp.dot(f.astype(jnp.bfloat16), w2_ref[l],
                        preferred_element_type=jnp.float32) + b2
        return x

    x = lax.fori_loop(0, L, layer, x0_ref[...], unroll=True)

    # ---------------- ln_final + EOT pooling + text projection ----------------
    lnf = lnf_ref[...]
    xf = _layernorm(x, lnf[0:1, :], lnf[1:2, :])                             # [BS, D]
    pooled = jnp.dot(pool_ref[...], xf, preferred_element_type=jnp.float32)  # [B, D]
    out_ref[...] = jnp.dot(pooled.astype(jnp.bfloat16), proj_ref[...],
                           preferred_element_type=jnp.float32)               # [B, OUT_DIM]


# ----------------------------- one-time weight / constant packing ----------------
def pack_params(params):
    """Stack per-layer tensors on a leading L axis, pre-transpose the PyTorch [out,in]
    weights to [in,out], fold the 1/sqrt(HD) q-scale into the QKV projection, cast matmul
    weights to bf16, and build all layer-invariant attention constants."""
    lys = params['layers']
    st = lambda name: jnp.stack([lp[name] for lp in lys], axis=0)

    # QKV projection with the attention scale folded into the Q output columns + bias.
    qscale = jnp.concatenate([jnp.full((D,), _SCALE, jnp.float32),
                              jnp.ones((2 * D,), jnp.float32)])
    wqkv_t = jnp.stack([lp['in_proj_w'].T for lp in lys], axis=0)            # [L, D, 3D]
    wqkv_t = (wqkv_t * qscale[None, None, :]).astype(jnp.bfloat16)
    bqkv = st('in_proj_b').reshape(L, 1, 3 * D) * qscale[None, None, :]

    # Consolidated per-layer D-width vectors (one input instead of six).
    zero = jnp.zeros((D,), jnp.float32)
    vecs = jnp.stack([
        jnp.stack([lp['ln1_g'], lp['ln1_b'], lp['ln2_g'], lp['ln2_b'],
                   lp['out_proj_b'], lp['proj_b'], zero, zero], axis=0)
        for lp in lys], axis=0)                                              # [L, 8, D]

    # ---- layer-invariant attention constants (hoisted out of the kernel loop) ----
    n = jnp.arange(BHS)                  # packed key column: b*H*S + h*S + kpos
    r = jnp.arange(BS)                   # folded query row:  b*S + qpos
    c = jnp.arange(D)                    # feature column:    h*HD + d
    nb, nh, nk = n // (H * S), (n % (H * S)) // S, n % S
    rb, rq = r // S, r % S

    attn_bias = jnp.where((nb[None, :] == rb[:, None]) & (nk[None, :] <= rq[:, None]),
                          0.0, NEG_INF).astype(jnp.float32)                  # [BS, BHS]
    expand = (r[None, :] == (nb * S + nk)[:, None]).astype(jnp.bfloat16)     # [BHS, BS]
    head_mask = (nh[:, None] == (c[None, :] // HD)).astype(jnp.bfloat16)     # [BHS, D]
    seg = (nh[:, None] == jnp.arange(H)[None, :]).astype(jnp.bfloat16)       # [BHS, H]
    colmap = (jnp.arange(H)[:, None] == (c[None, :] // HD)).astype(jnp.bfloat16)  # [H, D]

    return {
        'tok_emb': params['token_embedding'],
        'pos_emb': params['positional_embedding'],
        'vecs': vecs,
        'wqkv_t': wqkv_t, 'bqkv': bqkv,
        'wo_t': jnp.stack([lp['out_proj_w'].T for lp in lys], 0).astype(jnp.bfloat16),
        'w1_t': jnp.stack([lp['fc_w'].T for lp in lys], 0).astype(jnp.bfloat16),
        'b1': st('fc_b').reshape(L, 1, FF),
        'w2_t': jnp.stack([lp['proj_w'].T for lp in lys], 0).astype(jnp.bfloat16),
        'lnf': jnp.stack([params['ln_final_g'], params['ln_final_b']], axis=0),
        'proj': params['text_projection'].astype(jnp.bfloat16),
        'attn_bias': attn_bias, 'expand': expand, 'head_mask': head_mask,
        'seg': seg, 'colmap': colmap,
    }


# ----------------------------- wrapper (glue) ----------------------------------
@jax.jit
def clip_encode_text(tokens, pk):
    # Token-embedding gather + positional add (data-dependent HBM gather stays in JAX glue).
    x0 = jnp.take(pk['tok_emb'], tokens.reshape(-1), axis=0).astype(jnp.float32)
    x0 = (x0.reshape(B, S, D) + pk['pos_emb'][None, :, :]).reshape(BS, D)

    # EOT (argmax token id) pooling as a lane-dense one-hot selection matmul.
    eot = jnp.argmax(tokens, axis=-1)                                        # [B]
    pool = jax.nn.one_hot(jnp.arange(B) * S + eot, BS, dtype=jnp.float32)    # [B, BS]

    args = (x0, pool, pk['attn_bias'], pk['expand'], pk['head_mask'], pk['seg'],
            pk['colmap'], pk['vecs'], pk['wqkv_t'], pk['bqkv'], pk['wo_t'],
            pk['w1_t'], pk['b1'], pk['w2_t'], pk['lnf'], pk['proj'])

    # Single program: everything resident in VMEM, fetched exactly once.
    in_specs = [pl.BlockSpec(a.shape, lambda i, nd=a.ndim: (0,) * nd) for a in args]

    # NOTE: at real CLIP text-encoder size, switch back to a streamed-over-L grid and set
    # pltpu.CompilerParams(vmem_limit_bytes=...) (v5e 16 MiB scoped default is too small).
    out = pl.pallas_call(
        clip_fused_kernel,
        out_shape=jax.ShapeDtypeStruct((B, OUT_DIM), jnp.float32),
        grid=(1,),
        in_specs=in_specs,
        out_specs=pl.BlockSpec((B, OUT_DIM), lambda i: (0, 0)),
        compiler_params=pltpu.CompilerParams(dimension_semantics=("arbitrary",)),
    )(*args)
    return out


# ----------------------------- deterministic params ----------------------------
def init_params(key):
    # Synthetic deterministic init (PyTorch-style layouts; no pretrained checkpoint).
    def nrm(k, shape, scale=0.02):
        return scale * jax.random.normal(k, shape, dtype=jnp.float32)

    keys = iter(jax.random.split(key, 8 + 8 * L))
    params = {
        'token_embedding': nrm(next(keys), (VOCAB, D)),
        'positional_embedding': nrm(next(keys), (S, D), 0.01),
        'ln_final_g': jnp.ones((D,), jnp.float32),
        'ln_final_b': jnp.zeros((D,), jnp.float32),
        'text_projection': nrm(next(keys), (D, OUT_DIM)),
        'layers': [],
    }
    for _ in range(L):
        params['layers'].append({
            'ln1_g': jnp.ones((D,), jnp.float32),
            'ln1_b': jnp.zeros((D,), jnp.float32),
            'in_proj_w': nrm(next(keys), (3 * D, D)),   # MultiheadAttention.in_proj_weight
            'in_proj_b': jnp.zeros((3 * D,), jnp.float32),
            'out_proj_w': nrm(next(keys), (D, D)),      # MultiheadAttention.out_proj
            'out_proj_b': jnp.zeros((D,), jnp.float32),
            'ln2_g': jnp.ones((D,), jnp.float32),
            'ln2_b': jnp.zeros((D,), jnp.float32),
            'fc_w': nrm(next(keys), (FF, D)),           # mlp.c_fc
            'fc_b': jnp.zeros((FF,), jnp.float32),
            'proj_w': nrm(next(keys), (D, FF)),         # mlp.c_proj
            'proj_b': jnp.zeros((D,), jnp.float32),
        })
    return params


if __name__ == "__main__":
    key = jax.random.PRNGKey(0)
    pkey, tkey = jax.random.split(key)
    params = init_params(pkey)
    packed = pack_params(params)    # one-time transpose/stack/bf16 cast + constant masks

    # Deterministic tokens; EOT (highest id) at different positions per sequence.
    tokens = jax.random.randint(tkey, (B, S), 1, VOCAB - 1, dtype=jnp.int32)
    eot_pos = jnp.array([S - 1, 4], dtype=jnp.int32)
    tokens = tokens.at[jnp.arange(B), eot_pos].set(VOCAB - 1)

    out = clip_encode_text(tokens, packed)
    out = jax.block_until_ready(out)
    assert out.shape == (B, OUT_DIM) and out.dtype == jnp.float32
    print("KERNEL_OK")
</pallas_src>

<mosaic_0001>
module attributes {stable_mosaic.version = 11 : i64} {
  func.func @clip_fused_kernel(%arg0: i32, %arg1: memref<16x32xf32, #tpu.memory_space<vmem>>, %arg2: memref<2x16xf32, #tpu.memory_space<vmem>>, %arg3: memref<16x64xf32, #tpu.memory_space<vmem>>, %arg4: memref<64x16xbf16, #tpu.memory_space<vmem>>, %arg5: memref<64x32xbf16, #tpu.memory_space<vmem>>, %arg6: memref<64x4xbf16, #tpu.memory_space<vmem>>, %arg7: memref<4x32xbf16, #tpu.memory_space<vmem>>, %arg8: memref<2x8x32xf32, #tpu.memory_space<vmem>>, %arg9: memref<2x32x96xbf16, #tpu.memory_space<vmem>>, %arg10: memref<2x1x96xf32, #tpu.memory_space<vmem>>, %arg11: memref<2x32x32xbf16, #tpu.memory_space<vmem>>, %arg12: memref<2x32x128xbf16, #tpu.memory_space<vmem>>, %arg13: memref<2x1x128xf32, #tpu.memory_space<vmem>>, %arg14: memref<2x128x32xbf16, #tpu.memory_space<vmem>>, %arg15: memref<2x32xf32, #tpu.memory_space<vmem>>, %arg16: memref<32x64xbf16, #tpu.memory_space<vmem>>, %arg17: memref<2x64xf32, #tpu.memory_space<vmem>>) attributes {dimension_semantics = [#tpu.dimension_semantics<arbitrary>], iteration_bounds = array<i64: 1>, scalar_prefetch = 0 : i64, scratch_operands = 0 : i64, tpu.core_type = #tpu.core_type<tc>, window_params = [{pipeline_mode = #tpu.pipeline_mode<synchronous>, transform_indices = @transform_0, window_bounds = array<i64: 16, 32>}, {pipeline_mode = #tpu.pipeline_mode<synchronous>, transform_indices = @transform_1, window_bounds = array<i64: 2, 16>}, {pipeline_mode = #tpu.pipeline_mode<synchronous>, transform_indices = @transform_2, window_bounds = array<i64: 16, 64>}, {pipeline_mode = #tpu.pipeline_mode<synchronous>, transform_indices = @transform_3, window_bounds = array<i64: 64, 16>}, {pipeline_mode = #tpu.pipeline_mode<synchronous>, transform_indices = @transform_4, window_bounds = array<i64: 64, 32>}, {pipeline_mode = #tpu.pipeline_mode<synchronous>, transform_indices = @transform_5, window_bounds = array<i64: 64, 4>}, {pipeline_mode = #tpu.pipeline_mode<synchronous>, transform_indices = @transform_6, window_bounds = array<i64: 4, 32>}, {pipeline_mode = #tpu.pipeline_mode<synchronous>, transform_indices = @transform_7, window_bounds = array<i64: 2, 8, 32>}, {pipeline_mode = #tpu.pipeline_mode<synchronous>, transform_indices = @transform_8, window_bounds = array<i64: 2, 32, 96>}, {pipeline_mode = #tpu.pipeline_mode<synchronous>, transform_indices = @transform_9, window_bounds = array<i64: 2, 1, 96>}, {pipeline_mode = #tpu.pipeline_mode<synchronous>, transform_indices = @transform_10, window_bounds = array<i64: 2, 32, 32>}, {pipeline_mode = #tpu.pipeline_mode<synchronous>, transform_indices = @transform_11, window_bounds = array<i64: 2, 32, 128>}, {pipeline_mode = #tpu.pipeline_mode<synchronous>, transform_indices = @transform_12, window_bounds = array<i64: 2, 1, 128>}, {pipeline_mode = #tpu.pipeline_mode<synchronous>, transform_indices = @transform_13, window_bounds = array<i64: 2, 128, 32>}, {pipeline_mode = #tpu.pipeline_mode<synchronous>, transform_indices = @transform_14, window_bounds = array<i64: 2, 32>}, {pipeline_mode = #tpu.pipeline_mode<synchronous>, transform_indices = @transform_15, window_bounds = array<i64: 32, 64>}, {pipeline_mode = #tpu.pipeline_mode<synchronous>, transform_indices = @transform_16, window_bounds = array<i64: 2, 64>}]} {
    %c0 = arith.constant 0 : index
    %c0_0 = arith.constant 0 : index
    %0 = vector.load %arg3[%c0, %c0_0] : memref<16x64xf32, #tpu.memory_space<vmem>>, vector<16x64xf32>
    %c0_1 = arith.constant 0 : index
    %c0_2 = arith.constant 0 : index
    %1 = vector.load %arg4[%c0_1, %c0_2] : memref<64x16xbf16, #tpu.memory_space<vmem>>, vector<64x16xbf16>
    %c0_3 = arith.constant 0 : index
    %c0_4 = arith.constant 0 : index
    %2 = vector.load %arg5[%c0_3, %c0_4] : memref<64x32xbf16, #tpu.memory_space<vmem>>, vector<64x32xbf16>
    %c0_5 = arith.constant 0 : index
    %c0_6 = arith.constant 0 : index
    %3 = vector.load %arg6[%c0_5, %c0_6] : memref<64x4xbf16, #tpu.memory_space<vmem>>, vector<64x4xbf16>
    %c0_7 = arith.constant 0 : index
    %c0_8 = arith.constant 0 : index
    %4 = vector.load %arg7[%c0_7, %c0_8] : memref<4x32xbf16, #tpu.memory_space<vmem>>, vector<4x32xbf16>
    %c0_9 = arith.constant 0 : index
    %c0_10 = arith.constant 0 : index
    %5 = vector.load %arg1[%c0_9, %c0_10] : memref<16x32xf32, #tpu.memory_space<vmem>>, vector<16x32xf32>
    %c0_i32 = arith.constant 0 : i32
    %6 = arith.index_cast %c0_i32 : i32 to index
    %c0_11 = arith.constant 0 : index
    %c0_12 = arith.constant 0 : index
    %7 = vector.load %arg8[%6, %c0_11, %c0_12] : memref<2x8x32xf32, #tpu.memory_space<vmem>>, vector<1x8x32xf32>
    %8 = vector.shape_cast %7 : vector<1x8x32xf32> to vector<8x32xf32>
    %9 = vector.extract_strided_slice %8 {offsets = [0, 0], sizes = [1, 32], strides = [1, 1]} : vector<8x32xf32> to vector<1x32xf32>
    %10 = vector.extract_strided_slice %8 {offsets = [1, 0], sizes = [1, 32], strides = [1, 1]} : vector<8x32xf32> to vector<1x32xf32>
    %11 = vector.extract_strided_slice %8 {offsets = [2, 0], sizes = [1, 32], strides = [1, 1]} : vector<8x32xf32> to vector<1x32xf32>
    %12 = vector.extract_strided_slice %8 {offsets = [3, 0], sizes = [1, 32], strides = [1, 1]} : vector<8x32xf32> to vector<1x32xf32>
    %13 = vector.extract_strided_slice %8 {offsets = [4, 0], sizes = [1, 32], strides = [1, 1]} : vector<8x32xf32> to vector<1x32xf32>
    %14 = vector.extract_strided_slice %8 {offsets = [5, 0], sizes = [1, 32], strides = [1, 1]} : vector<8x32xf32> to vector<1x32xf32>
    %cst = arith.constant dense<0.000000e+00> : vector<16xf32>
    %15 = vector.multi_reduction <add>, %5, %cst [1] : vector<16x32xf32> to vector<16xf32>
    %16 = vector.shape_cast %15 : vector<16xf32> to vector<16x1xf32>
    %cst_13 = arith.constant 3.200000e+01 : f32
    %17 = vector.broadcast %cst_13 : f32 to vector<16x1xf32>
    %18 = arith.divf %16, %17 : vector<16x1xf32>
    %19 = vector.broadcast %18 : vector<16x1xf32> to vector<16x32xf32>
    %20 = arith.subf %5, %19 : vector<16x32xf32>
    %21 = arith.mulf %20, %20 : vector<16x32xf32>
    %cst_14 = arith.constant dense<0.000000e+00> : vector<16xf32>
    %22 = vector.multi_reduction <add>, %21, %cst_14 [1] : vector<16x32xf32> to vector<16xf32>
    %23 = vector.shape_cast %22 : vector<16xf32> to vector<16x1xf32>
    %cst_15 = arith.constant 3.200000e+01 : f32
    %24 = vector.broadcast %cst_15 : f32 to vector<16x1xf32>
    %25 = arith.divf %23, %24 : vector<16x1xf32>
    %26 = vector.broadcast %18 : vector<16x1xf32> to vector<16x32xf32>
    %27 = arith.subf %5, %26 : vector<16x32xf32>
    %cst_16 = arith.constant 9.99999974E-6 : f32
    %28 = vector.broadcast %cst_16 : f32 to vector<16x1xf32>
    %29 = arith.addf %25, %28 : vector<16x1xf32>
    %30 = math.rsqrt %29 : vector<16x1xf32>
    %31 = vector.broadcast %30 : vector<16x1xf32> to vector<16x32xf32>
    %32 = arith.mulf %27, %31 : vector<16x32xf32>
    %33 = vector.broadcast %9 : vector<1x32xf32> to vector<16x32xf32>
    %34 = arith.mulf %32, %33 : vector<16x32xf32>
    %35 = vector.broadcast %10 : vector<1x32xf32> to vector<16x32xf32>
    %36 = arith.addf %34, %35 : vector<16x32xf32>
    %37 = arith.truncf %36 : vector<16x32xf32> to vector<16x32xbf16>
    %38 = arith.index_cast %c0_i32 : i32 to index
    %c0_17 = arith.constant 0 : index
    %c0_18 = arith.constant 0 : index
    %39 = vector.load %arg9[%38, %c0_17, %c0_18] : memref<2x32x96xbf16, #tpu.memory_space<vmem>>, vector<1x32x96xbf16>
    %40 = vector.shape_cast %39 : vector<1x32x96xbf16> to vector<32x96xbf16>
    %cst_19 = arith.constant dense<0.000000e+00> : vector<16x96xf32>
    %41 = tpu.matmul %37, %40, %cst_19 {dimension_numbers = #tpu.dot_dimension_numbers<[1], [0], [0], [1], [0, 0, 1, 1], [], []>} : vector<16x32xbf16>, vector<32x96xbf16>, vector<16x96xf32> -> vector<16x96xf32>
    %42 = arith.index_cast %c0_i32 : i32 to index
    %c0_20 = arith.constant 0 : index
    %c0_21 = arith.constant 0 : index
    %43 = vector.load %arg10[%42, %c0_20, %c0_21] : memref<2x1x96xf32, #tpu.memory_space<vmem>>, vector<1x1x96xf32>
    %44 = vector.shape_cast %43 : vector<1x1x96xf32> to vector<1x96xf32>
    %45 = vector.broadcast %44 : vector<1x96xf32> to vector<16x96xf32>
    %46 = arith.addf %41, %45 : vector<16x96xf32>
    %47 = vector.extract_strided_slice %46 {offsets = [0, 0], sizes = [16, 32], strides = [1, 1]} : vector<16x96xf32> to vector<16x32xf32>
    %48 = arith.truncf %47 : vector<16x32xf32> to vector<16x32xbf16>
    %49 = vector.extract_strided_slice %46 {offsets = [0, 32], sizes = [16, 32], strides = [1, 1]} : vector<16x96xf32> to vector<16x32xf32>
    %50 = arith.truncf %49 : vector<16x32xf32> to vector<16x32xbf16>
    %51 = vector.extract_strided_slice %46 {offsets = [0, 64], sizes = [16, 32], strides = [1, 1]} : vector<16x96xf32> to vector<16x32xf32>
    %52 = arith.truncf %51 : vector<16x32xf32> to vector<16x32xbf16>
    %cst_22 = arith.constant dense<0.000000e+00> : vector<64x32xf32>
    %53 = tpu.matmul %1, %50, %cst_22 {dimension_numbers = #tpu.dot_dimension_numbers<[1], [0], [0], [1], [0, 0, 1, 1], [], []>} : vector<64x16xbf16>, vector<16x32xbf16>, vector<64x32xf32> -> vector<64x32xf32>
    %54 = arith.truncf %53 : vector<64x32xf32> to vector<64x32xbf16>
    %55 = arith.mulf %54, %2 : vector<64x32xbf16>
    %cst_23 = arith.constant dense<0.000000e+00> : vector<64x32xf32>
    %56 = tpu.matmul %1, %52, %cst_23 {dimension_numbers = #tpu.dot_dimension_numbers<[1], [0], [0], [1], [0, 0, 1, 1], [], []>} : vector<64x16xbf16>, vector<16x32xbf16>, vector<64x32xf32> -> vector<64x32xf32>
    %57 = arith.truncf %56 : vector<64x32xf32> to vector<64x32xbf16>
    %58 = arith.mulf %57, %2 : vector<64x32xbf16>
    %cst_24 = arith.constant dense<0.000000e+00> : vector<16x64xf32>
    %59 = tpu.matmul %48, %55, %cst_24 {dimension_numbers = #tpu.dot_dimension_numbers<[1], [1], [0], [0], [0, 0, 1, 0], [], []>} : vector<16x32xbf16>, vector<64x32xbf16>, vector<16x64xf32> -> vector<16x64xf32>
    %60 = arith.addf %59, %0 : vector<16x64xf32>
    %cst_25 = arith.constant dense<0xFF800000> : vector<16xf32>
    %61 = vector.multi_reduction <maximumf>, %60, %cst_25 [1] : vector<16x64xf32> to vector<16xf32>
    %62 = vector.shape_cast %61 : vector<16xf32> to vector<16x1xf32>
    %63 = vector.broadcast %62 : vector<16x1xf32> to vector<16x64xf32>
    %64 = arith.subf %60, %63 : vector<16x64xf32>
    %65 = math.exp %64 : vector<16x64xf32>
    %66 = arith.truncf %65 : vector<16x64xf32> to vector<16x64xbf16>
    %cst_26 = arith.constant dense<0.000000e+00> : vector<16x32xf32>
    %67 = tpu.matmul %66, %58, %cst_26 {dimension_numbers = #tpu.dot_dimension_numbers<[1], [0], [0], [1], [0, 0, 1, 1], [], []>} : vector<16x64xbf16>, vector<64x32xbf16>, vector<16x32xf32> -> vector<16x32xf32>
    %cst_27 = arith.constant dense<0.000000e+00> : vector<16x4xf32>
    %68 = tpu.matmul %66, %3, %cst_27 {dimension_numbers = #tpu.dot_dimension_numbers<[1], [0], [0], [1], [0, 0, 1, 1], [], []>} : vector<16x64xbf16>, vector<64x4xbf16>, vector<16x4xf32> -> vector<16x4xf32>
    %69 = arith.truncf %68 : vector<16x4xf32> to vector<16x4xbf16>
    %cst_28 = arith.constant dense<0.000000e+00> : vector<16x32xf32>
    %70 = tpu.matmul %69, %4, %cst_28 {dimension_numbers = #tpu.dot_dimension_numbers<[1], [0], [0], [1], [0, 0, 1, 1], [], []>} : vector<16x4xbf16>, vector<4x32xbf16>, vector<16x32xf32> -> vector<16x32xf32>
    %71 = tpu.reciprocal %70 {approx = true} : vector<16x32xf32> -> vector<16x32xf32>
    %72 = arith.mulf %67, %71 : vector<16x32xf32>
    %73 = arith.truncf %72 : vector<16x32xf32> to vector<16x32xbf16>
    %74 = arith.index_cast %c0_i32 : i32 to index
    %c0_29 = arith.constant 0 : index
    %c0_30 = arith.constant 0 : index
    %75 = vector.load %arg11[%74, %c0_29, %c0_30] : memref<2x32x32xbf16, #tpu.memory_space<vmem>>, vector<1x32x32xbf16>
    %76 = vector.shape_cast %75 : vector<1x32x32xbf16> to vector<32x32xbf16>
    %cst_31 = arith.constant dense<0.000000e+00> : vector<16x32xf32>
    %77 = tpu.matmul %73, %76, %cst_31 {dimension_numbers = #tpu.dot_dimension_numbers<[1], [0], [0], [1], [0, 0, 1, 1], [], []>} : vector<16x32xbf16>, vector<32x32xbf16>, vector<16x32xf32> -> vector<16x32xf32>
    %78 = arith.addf %5, %77 : vector<16x32xf32>
    %79 = vector.broadcast %13 : vector<1x32xf32> to vector<16x32xf32>
    %80 = arith.addf %78, %79 : vector<16x32xf32>
    %cst_32 = arith.constant dense<0.000000e+00> : vector<16xf32>
    %81 = vector.multi_reduction <add>, %80, %cst_32 [1] : vector<16x32xf32> to vector<16xf32>
    %82 = vector.shape_cast %81 : vector<16xf32> to vector<16x1xf32>
    %cst_33 = arith.constant 3.200000e+01 : f32
    %83 = vector.broadcast %cst_33 : f32 to vector<16x1xf32>
    %84 = arith.divf %82, %83 : vector<16x1xf32>
    %85 = vector.broadcast %84 : vector<16x1xf32> to vector<16x32xf32>
    %86 = arith.subf %80, %85 : vector<16x32xf32>
    %87 = arith.mulf %86, %86 : vector<16x32xf32>
    %cst_34 = arith.constant dense<0.000000e+00> : vector<16xf32>
    %88 = vector.multi_reduction <add>, %87, %cst_34 [1] : vector<16x32xf32> to vector<16xf32>
    %89 = vector.shape_cast %88 : vector<16xf32> to vector<16x1xf32>
    %cst_35 = arith.constant 3.200000e+01 : f32
    %90 = vector.broadcast %cst_35 : f32 to vector<16x1xf32>
    %91 = arith.divf %89, %90 : vector<16x1xf32>
    %92 = vector.broadcast %84 : vector<16x1xf32> to vector<16x32xf32>
    %93 = arith.subf %80, %92 : vector<16x32xf32>
    %cst_36 = arith.constant 9.99999974E-6 : f32
    %94 = vector.broadcast %cst_36 : f32 to vector<16x1xf32>
    %95 = arith.addf %91, %94 : vector<16x1xf32>
    %96 = math.rsqrt %95 : vector<16x1xf32>
    %97 = vector.broadcast %96 : vector<16x1xf32> to vector<16x32xf32>
    %98 = arith.mulf %93, %97 : vector<16x32xf32>
    %99 = vector.broadcast %11 : vector<1x32xf32> to vector<16x32xf32>
    %100 = arith.mulf %98, %99 : vector<16x32xf32>
    %101 = vector.broadcast %12 : vector<1x32xf32> to vector<16x32xf32>
    %102 = arith.addf %100, %101 : vector<16x32xf32>
    %103 = arith.truncf %102 : vector<16x32xf32> to vector<16x32xbf16>
    %104 = arith.index_cast %c0_i32 : i32 to index
    %c0_37 = arith.constant 0 : index
    %c0_38 = arith.constant 0 : index
    %105 = vector.load %arg12[%104, %c0_37, %c0_38] : memref<2x32x128xbf16, #tpu.memory_space<vmem>>, vector<1x32x128xbf16>
    %106 = vector.shape_cast %105 : vector<1x32x128xbf16> to vector<32x128xbf16>
    %cst_39 = arith.constant dense<0.000000e+00> : vector<16x128xf32>
    %107 = tpu.matmul %103, %106, %cst_39 {dimension_numbers = #tpu.dot_dimension_numbers<[1], [0], [0], [1], [0, 0, 1, 1], [], []>} : vector<16x32xbf16>, vector<32x128xbf16>, vector<16x128xf32> -> vector<16x128xf32>
    %108 = arith.index_cast %c0_i32 : i32 to index
    %c0_40 = arith.constant 0 : index
    %c0_41 = arith.constant 0 : index
    %109 = vector.load %arg13[%108, %c0_40, %c0_41] : memref<2x1x128xf32, #tpu.memory_space<vmem>>, vector<1x1x128xf32>
    %110 = vector.shape_cast %109 : vector<1x1x128xf32> to vector<1x128xf32>
    %111 = vector.broadcast %110 : vector<1x128xf32> to vector<16x128xf32>
    %112 = arith.addf %107, %111 : vector<16x128xf32>
    %113 = arith.mulf %112, %112 : vector<16x128xf32>
    %114 = arith.mulf %112, %113 : vector<16x128xf32>
    %cst_42 = arith.constant 4.471500e-02 : f32
    %115 = vector.broadcast %cst_42 : f32 to vector<16x128xf32>
    %116 = arith.mulf %115, %114 : vector<16x128xf32>
    %117 = arith.addf %112, %116 : vector<16x128xf32>
    %cst_43 = arith.constant 0.797884583 : f32
    %118 = vector.broadcast %cst_43 : f32 to vector<16x128xf32>
    %119 = arith.mulf %118, %117 : vector<16x128xf32>
    %120 = math.tanh %119 : vector<16x128xf32>
    %cst_44 = arith.constant 1.000000e+00 : f32
    %121 = vector.broadcast %cst_44 : f32 to vector<16x128xf32>
    %122 = arith.addf %121, %120 : vector<16x128xf32>
    %cst_45 = arith.constant 5.000000e-01 : f32
    %123 = vector.broadcast %cst_45 : f32 to vector<16x128xf32>
    %124 = arith.mulf %123, %122 : vector<16x128xf32>
    %125 = arith.mulf %112, %124 : vector<16x128xf32>
    %126 = arith.truncf %125 : vector<16x128xf32> to vector<16x128xbf16>
    %127 = arith.index_cast %c0_i32 : i32 to index
    %c0_46 = arith.constant 0 : index
    %c0_47 = arith.constant 0 : index
    %128 = vector.load %arg14[%127, %c0_46, %c0_47] : memref<2x128x32xbf16, #tpu.memory_space<vmem>>, vector<1x128x32xbf16>
    %129 = vector.shape_cast %128 : vector<1x128x32xbf16> to vector<128x32xbf16>
    %cst_48 = arith.constant dense<0.000000e+00> : vector<16x32xf32>
    %130 = tpu.matmul %126, %129, %cst_48 {dimension_numbers = #tpu.dot_dimension_numbers<[1], [0], [0], [1], [0, 0, 1, 1], [], []>} : vector<16x128xbf16>, vector<128x32xbf16>, vector<16x32xf32> -> vector<16x32xf32>
    %131 = arith.addf %80, %130 : vector<16x32xf32>
    %132 = vector.broadcast %14 : vector<1x32xf32> to vector<16x32xf32>
    %133 = arith.addf %131, %132 : vector<16x32xf32>
    %c1_i32 = arith.constant 1 : i32
    %134 = arith.index_cast %c1_i32 : i32 to index
    %c0_49 = arith.constant 0 : index
    %c0_50 = arith.constant 0 : index
    %135 = vector.load %arg8[%134, %c0_49, %c0_50] : memref<2x8x32xf32, #tpu.memory_space<vmem>>, vector<1x8x32xf32>
    %136 = vector.shape_cast %135 : vector<1x8x32xf32> to vector<8x32xf32>
    %137 = vector.extract_strided_slice %136 {offsets = [0, 0], sizes = [1, 32], strides = [1, 1]} : vector<8x32xf32> to vector<1x32xf32>
    %138 = vector.extract_strided_slice %136 {offsets = [1, 0], sizes = [1, 32], strides = [1, 1]} : vector<8x32xf32> to vector<1x32xf32>
    %139 = vector.extract_strided_slice %136 {offsets = [2, 0], sizes = [1, 32], strides = [1, 1]} : vector<8x32xf32> to vector<1x32xf32>
    %140 = vector.extract_strided_slice %136 {offsets = [3, 0], sizes = [1, 32], strides = [1, 1]} : vector<8x32xf32> to vector<1x32xf32>
    %141 = vector.extract_strided_slice %136 {offsets = [4, 0], sizes = [1, 32], strides = [1, 1]} : vector<8x32xf32> to vector<1x32xf32>
    %142 = vector.extract_strided_slice %136 {offsets = [5, 0], sizes = [1, 32], strides = [1, 1]} : vector<8x32xf32> to vector<1x32xf32>
    %cst_51 = arith.constant dense<0.000000e+00> : vector<16xf32>
    %143 = vector.multi_reduction <add>, %133, %cst_51 [1] : vector<16x32xf32> to vector<16xf32>
    %144 = vector.shape_cast %143 : vector<16xf32> to vector<16x1xf32>
    %cst_52 = arith.constant 3.200000e+01 : f32
    %145 = vector.broadcast %cst_52 : f32 to vector<16x1xf32>
    %146 = arith.divf %144, %145 : vector<16x1xf32>
    %147 = vector.broadcast %146 : vector<16x1xf32> to vector<16x32xf32>
    %148 = arith.subf %133, %147 : vector<16x32xf32>
    %149 = arith.mulf %148, %148 : vector<16x32xf32>
    %cst_53 = arith.constant dense<0.000000e+00> : vector<16xf32>
    %150 = vector.multi_reduction <add>, %149, %cst_53 [1] : vector<16x32xf32> to vector<16xf32>
    %151 = vector.shape_cast %150 : vector<16xf32> to vector<16x1xf32>
    %cst_54 = arith.constant 3.200000e+01 : f32
    %152 = vector.broadcast %cst_54 : f32 to vector<16x1xf32>
    %153 = arith.divf %151, %152 : vector<16x1xf32>
    %154 = vector.broadcast %146 : vector<16x1xf32> to vector<16x32xf32>
    %155 = arith.subf %133, %154 : vector<16x32xf32>
    %cst_55 = arith.constant 9.99999974E-6 : f32
    %156 = vector.broadcast %cst_55 : f32 to vector<16x1xf32>
    %157 = arith.addf %153, %156 : vector<16x1xf32>
    %158 = math.rsqrt %157 : vector<16x1xf32>
    %159 = vector.broadcast %158 : vector<16x1xf32> to vector<16x32xf32>
    %160 = arith.mulf %155, %159 : vector<16x32xf32>
    %161 = vector.broadcast %137 : vector<1x32xf32> to vector<16x32xf32>
    %162 = arith.mulf %160, %161 : vector<16x32xf32>
    %163 = vector.broadcast %138 : vector<1x32xf32> to vector<16x32xf32>
    %164 = arith.addf %162, %163 : vector<16x32xf32>
    %165 = arith.truncf %164 : vector<16x32xf32> to vector<16x32xbf16>
    %166 = arith.index_cast %c1_i32 : i32 to index
    %c0_56 = arith.constant 0 : index
    %c0_57 = arith.constant 0 : index
    %167 = vector.load %arg9[%166, %c0_56, %c0_57] : memref<2x32x96xbf16, #tpu.memory_space<vmem>>, vector<1x32x96xbf16>
    %168 = vector.shape_cast %167 : vector<1x32x96xbf16> to vector<32x96xbf16>
    %cst_58 = arith.constant dense<0.000000e+00> : vector<16x96xf32>
    %169 = tpu.matmul %165, %168, %cst_58 {dimension_numbers = #tpu.dot_dimension_numbers<[1], [0], [0], [1], [0, 0, 1, 1], [], []>} : vector<16x32xbf16>, vector<32x96xbf16>, vector<16x96xf32> -> vector<16x96xf32>
    %170 = arith.index_cast %c1_i32 : i32 to index
    %c0_59 = arith.constant 0 : index
    %c0_60 = arith.constant 0 : index
    %171 = vector.load %arg10[%170, %c0_59, %c0_60] : memref<2x1x96xf32, #tpu.memory_space<vmem>>, vector<1x1x96xf32>
    %172 = vector.shape_cast %171 : vector<1x1x96xf32> to vector<1x96xf32>
    %173 = vector.broadcast %172 : vector<1x96xf32> to vector<16x96xf32>
    %174 = arith.addf %169, %173 : vector<16x96xf32>
    %175 = vector.extract_strided_slice %174 {offsets = [0, 0], sizes = [16, 32], strides = [1, 1]} : vector<16x96xf32> to vector<16x32xf32>
    %176 = arith.truncf %175 : vector<16x32xf32> to vector<16x32xbf16>
    %177 = vector.extract_strided_slice %174 {offsets = [0, 32], sizes = [16, 32], strides = [1, 1]} : vector<16x96xf32> to vector<16x32xf32>
    %178 = arith.truncf %177 : vector<16x32xf32> to vector<16x32xbf16>
    %179 = vector.extract_strided_slice %174 {offsets = [0, 64], sizes = [16, 32], strides = [1, 1]} : vector<16x96xf32> to vector<16x32xf32>
    %180 = arith.truncf %179 : vector<16x32xf32> to vector<16x32xbf16>
    %cst_61 = arith.constant dense<0.000000e+00> : vector<64x32xf32>
    %181 = tpu.matmul %1, %178, %cst_61 {dimension_numbers = #tpu.dot_dimension_numbers<[1], [0], [0], [1], [0, 0, 1, 1], [], []>} : vector<64x16xbf16>, vector<16x32xbf16>, vector<64x32xf32> -> vector<64x32xf32>
    %182 = arith.truncf %181 : vector<64x32xf32> to vector<64x32xbf16>
    %183 = arith.mulf %182, %2 : vector<64x32xbf16>
    %cst_62 = arith.constant dense<0.000000e+00> : vector<64x32xf32>
    %184 = tpu.matmul %1, %180, %cst_62 {dimension_numbers = #tpu.dot_dimension_numbers<[1], [0], [0], [1], [0, 0, 1, 1], [], []>} : vector<64x16xbf16>, vector<16x32xbf16>, vector<64x32xf32> -> vector<64x32xf32>
    %185 = arith.truncf %184 : vector<64x32xf32> to vector<64x32xbf16>
    %186 = arith.mulf %185, %2 : vector<64x32xbf16>
    %cst_63 = arith.constant dense<0.000000e+00> : vector<16x64xf32>
    %187 = tpu.matmul %176, %183, %cst_63 {dimension_numbers = #tpu.dot_dimension_numbers<[1], [1], [0], [0], [0, 0, 1, 0], [], []>} : vector<16x32xbf16>, vector<64x32xbf16>, vector<16x64xf32> -> vector<16x64xf32>
    %188 = arith.addf %187, %0 : vector<16x64xf32>
    %cst_64 = arith.constant dense<0xFF800000> : vector<16xf32>
    %189 = vector.multi_reduction <maximumf>, %188, %cst_64 [1] : vector<16x64xf32> to vector<16xf32>
    %190 = vector.shape_cast %189 : vector<16xf32> to vector<16x1xf32>
    %191 = vector.broadcast %190 : vector<16x1xf32> to vector<16x64xf32>
    %192 = arith.subf %188, %191 : vector<16x64xf32>
    %193 = math.exp %192 : vector<16x64xf32>
    %194 = arith.truncf %193 : vector<16x64xf32> to vector<16x64xbf16>
    %cst_65 = arith.constant dense<0.000000e+00> : vector<16x32xf32>
    %195 = tpu.matmul %194, %186, %cst_65 {dimension_numbers = #tpu.dot_dimension_numbers<[1], [0], [0], [1], [0, 0, 1, 1], [], []>} : vector<16x64xbf16>, vector<64x32xbf16>, vector<16x32xf32> -> vector<16x32xf32>
    %cst_66 = arith.constant dense<0.000000e+00> : vector<16x4xf32>
    %196 = tpu.matmul %194, %3, %cst_66 {dimension_numbers = #tpu.dot_dimension_numbers<[1], [0], [0], [1], [0, 0, 1, 1], [], []>} : vector<16x64xbf16>, vector<64x4xbf16>, vector<16x4xf32> -> vector<16x4xf32>
    %197 = arith.truncf %196 : vector<16x4xf32> to vector<16x4xbf16>
    %cst_67 = arith.constant dense<0.000000e+00> : vector<16x32xf32>
    %198 = tpu.matmul %197, %4, %cst_67 {dimension_numbers = #tpu.dot_dimension_numbers<[1], [0], [0], [1], [0, 0, 1, 1], [], []>} : vector<16x4xbf16>, vector<4x32xbf16>, vector<16x32xf32> -> vector<16x32xf32>
    %199 = tpu.reciprocal %198 {approx = true} : vector<16x32xf32> -> vector<16x32xf32>
    %200 = arith.mulf %195, %199 : vector<16x32xf32>
    %201 = arith.truncf %200 : vector<16x32xf32> to vector<16x32xbf16>
    %202 = arith.index_cast %c1_i32 : i32 to index
    %c0_68 = arith.constant 0 : index
    %c0_69 = arith.constant 0 : index
    %203 = vector.load %arg11[%202, %c0_68, %c0_69] : memref<2x32x32xbf16, #tpu.memory_space<vmem>>, vector<1x32x32xbf16>
    %204 = vector.shape_cast %203 : vector<1x32x32xbf16> to vector<32x32xbf16>
    %cst_70 = arith.constant dense<0.000000e+00> : vector<16x32xf32>
    %205 = tpu.matmul %201, %204, %cst_70 {dimension_numbers = #tpu.dot_dimension_numbers<[1], [0], [0], [1], [0, 0, 1, 1], [], []>} : vector<16x32xbf16>, vector<32x32xbf16>, vector<16x32xf32> -> vector<16x32xf32>
    %206 = arith.addf %133, %205 : vector<16x32xf32>
    %207 = vector.broadcast %141 : vector<1x32xf32> to vector<16x32xf32>
    %208 = arith.addf %206, %207 : vector<16x32xf32>
    %cst_71 = arith.constant dense<0.000000e+00> : vector<16xf32>
    %209 = vector.multi_reduction <add>, %208, %cst_71 [1] : vector<16x32xf32> to vector<16xf32>
    %210 = vector.shape_cast %209 : vector<16xf32> to vector<16x1xf32>
    %cst_72 = arith.constant 3.200000e+01 : f32
    %211 = vector.broadcast %cst_72 : f32 to vector<16x1xf32>
    %212 = arith.divf %210, %211 : vector<16x1xf32>
    %213 = vector.broadcast %212 : vector<16x1xf32> to vector<16x32xf32>
    %214 = arith.subf %208, %213 : vector<16x32xf32>
    %215 = arith.mulf %214, %214 : vector<16x32xf32>
    %cst_73 = arith.constant dense<0.000000e+00> : vector<16xf32>
    %216 = vector.multi_reduction <add>, %215, %cst_73 [1] : vector<16x32xf32> to vector<16xf32>
    %217 = vector.shape_cast %216 : vector<16xf32> to vector<16x1xf32>
    %cst_74 = arith.constant 3.200000e+01 : f32
    %218 = vector.broadcast %cst_74 : f32 to vector<16x1xf32>
    %219 = arith.divf %217, %218 : vector<16x1xf32>
    %220 = vector.broadcast %212 : vector<16x1xf32> to vector<16x32xf32>
    %221 = arith.subf %208, %220 : vector<16x32xf32>
    %cst_75 = arith.constant 9.99999974E-6 : f32
    %222 = vector.broadcast %cst_75 : f32 to vector<16x1xf32>
    %223 = arith.addf %219, %222 : vector<16x1xf32>
    %224 = math.rsqrt %223 : vector<16x1xf32>
    %225 = vector.broadcast %224 : vector<16x1xf32> to vector<16x32xf32>
    %226 = arith.mulf %221, %225 : vector<16x32xf32>
    %227 = vector.broadcast %139 : vector<1x32xf32> to vector<16x32xf32>
    %228 = arith.mulf %226, %227 : vector<16x32xf32>
    %229 = vector.broadcast %140 : vector<1x32xf32> to vector<16x32xf32>
    %230 = arith.addf %228, %229 : vector<16x32xf32>
    %231 = arith.truncf %230 : vector<16x32xf32> to vector<16x32xbf16>
    %232 = arith.index_cast %c1_i32 : i32 to index
    %c0_76 = arith.constant 0 : index
    %c0_77 = arith.constant 0 : index
    %233 = vector.load %arg12[%232, %c0_76, %c0_77] : memref<2x32x128xbf16, #tpu.memory_space<vmem>>, vector<1x32x128xbf16>
    %234 = vector.shape_cast %233 : vector<1x32x128xbf16> to vector<32x128xbf16>
    %cst_78 = arith.constant dense<0.000000e+00> : vector<16x128xf32>
    %235 = tpu.matmul %231, %234, %cst_78 {dimension_numbers = #tpu.dot_dimension_numbers<[1], [0], [0], [1], [0, 0, 1, 1], [], []>} : vector<16x32xbf16>, vector<32x128xbf16>, vector<16x128xf32> -> vector<16x128xf32>
    %236 = arith.index_cast %c1_i32 : i32 to index
    %c0_79 = arith.constant 0 : index
    %c0_80 = arith.constant 0 : index
    %237 = vector.load %arg13[%236, %c0_79, %c0_80] : memref<2x1x128xf32, #tpu.memory_space<vmem>>, vector<1x1x128xf32>
    %238 = vector.shape_cast %237 : vector<1x1x128xf32> to vector<1x128xf32>
    %239 = vector.broadcast %238 : vector<1x128xf32> to vector<16x128xf32>
    %240 = arith.addf %235, %239 : vector<16x128xf32>
    %241 = arith.mulf %240, %240 : vector<16x128xf32>
    %242 = arith.mulf %240, %241 : vector<16x128xf32>
    %cst_81 = arith.constant 4.471500e-02 : f32
    %243 = vector.broadcast %cst_81 : f32 to vector<16x128xf32>
    %244 = arith.mulf %243, %242 : vector<16x128xf32>
    %245 = arith.addf %240, %244 : vector<16x128xf32>
    %cst_82 = arith.constant 0.797884583 : f32
    %246 = vector.broadcast %cst_82 : f32 to vector<16x128xf32>
    %247 = arith.mulf %246, %245 : vector<16x128xf32>
    %248 = math.tanh %247 : vector<16x128xf32>
    %cst_83 = arith.constant 1.000000e+00 : f32
    %249 = vector.broadcast %cst_83 : f32 to vector<16x128xf32>
    %250 = arith.addf %249, %248 : vector<16x128xf32>
    %cst_84 = arith.constant 5.000000e-01 : f32
    %251 = vector.broadcast %cst_84 : f32 to vector<16x128xf32>
    %252 = arith.mulf %251, %250 : vector<16x128xf32>
    %253 = arith.mulf %240, %252 : vector<16x128xf32>
    %254 = arith.truncf %253 : vector<16x128xf32> to vector<16x128xbf16>
    %255 = arith.index_cast %c1_i32 : i32 to index
    %c0_85 = arith.constant 0 : index
    %c0_86 = arith.constant 0 : index
    %256 = vector.load %arg14[%255, %c0_85, %c0_86] : memref<2x128x32xbf16, #tpu.memory_space<vmem>>, vector<1x128x32xbf16>
    %257 = vector.shape_cast %256 : vector<1x128x32xbf16> to vector<128x32xbf16>
    %cst_87 = arith.constant dense<0.000000e+00> : vector<16x32xf32>
    %258 = tpu.matmul %254, %257, %cst_87 {dimension_numbers = #tpu.dot_dimension_numbers<[1], [0], [0], [1], [0, 0, 1, 1], [], []>} : vector<16x128xbf16>, vector<128x32xbf16>, vector<16x32xf32> -> vector<16x32xf32>
    %259 = arith.addf %208, %258 : vector<16x32xf32>
    %260 = vector.broadcast %142 : vector<1x32xf32> to vector<16x32xf32>
    %261 = arith.addf %259, %260 : vector<16x32xf32>
    %c2_i32 = arith.constant 2 : i32
    %c0_88 = arith.constant 0 : index
    %c0_89 = arith.constant 0 : index
    %262 = vector.load %arg15[%c0_88, %c0_89] : memref<2x32xf32, #tpu.memory_space<vmem>>, vector<2x32xf32>
    %263 = vector.extract_strided_slice %262 {offsets = [0, 0], sizes = [1, 32], strides = [1, 1]} : vector<2x32xf32> to vector<1x32xf32>
    %264 = vector.extract_strided_slice %262 {offsets = [1, 0], sizes = [1, 32], strides = [1, 1]} : vector<2x32xf32> to vector<1x32xf32>
    %cst_90 = arith.constant dense<0.000000e+00> : vector<16xf32>
    %265 = vector.multi_reduction <add>, %261, %cst_90 [1] : vector<16x32xf32> to vector<16xf32>
    %266 = vector.shape_cast %265 : vector<16xf32> to vector<16x1xf32>
    %cst_91 = arith.constant 3.200000e+01 : f32
    %267 = vector.broadcast %cst_91 : f32 to vector<16x1xf32>
    %268 = arith.divf %266, %267 : vector<16x1xf32>
    %269 = vector.broadcast %268 : vector<16x1xf32> to vector<16x32xf32>
    %270 = arith.subf %261, %269 : vector<16x32xf32>
    %271 = arith.mulf %270, %270 : vector<16x32xf32>
    %cst_92 = arith.constant dense<0.000000e+00> : vector<16xf32>
    %272 = vector.multi_reduction <add>, %271, %cst_92 [1] : vector<16x32xf32> to vector<16xf32>
    %273 = vector.shape_cast %272 : vector<16xf32> to vector<16x1xf32>
    %cst_93 = arith.constant 3.200000e+01 : f32
    %274 = vector.broadcast %cst_93 : f32 to vector<16x1xf32>
    %275 = arith.divf %273, %274 : vector<16x1xf32>
    %276 = vector.broadcast %268 : vector<16x1xf32> to vector<16x32xf32>
    %277 = arith.subf %261, %276 : vector<16x32xf32>
    %cst_94 = arith.constant 9.99999974E-6 : f32
    %278 = vector.broadcast %cst_94 : f32 to vector<16x1xf32>
    %279 = arith.addf %275, %278 : vector<16x1xf32>
    %280 = math.rsqrt %279 : vector<16x1xf32>
    %281 = vector.broadcast %280 : vector<16x1xf32> to vector<16x32xf32>
    %282 = arith.mulf %277, %281 : vector<16x32xf32>
    %283 = vector.broadcast %263 : vector<1x32xf32> to vector<16x32xf32>
    %284 = arith.mulf %282, %283 : vector<16x32xf32>
    %285 = vector.broadcast %264 : vector<1x32xf32> to vector<16x32xf32>
    %286 = arith.addf %284, %285 : vector<16x32xf32>
    %c0_95 = arith.constant 0 : index
    %c0_96 = arith.constant 0 : index
    %287 = vector.load %arg2[%c0_95, %c0_96] : memref<2x16xf32, #tpu.memory_space<vmem>>, vector<2x16xf32>
    %cst_97 = arith.constant dense<0.000000e+00> : vector<2x32xf32>
    %288 = tpu.matmul %287, %286, %cst_97 {dimension_numbers = #tpu.dot_dimension_numbers<[1], [0], [0], [1], [0, 0, 1, 1], [], []>} : vector<2x16xf32>, vector<16x32xf32>, vector<2x32xf32> -> vector<2x32xf32>
    %289 = arith.truncf %288 : vector<2x32xf32> to vector<2x32xbf16>
    %c0_98 = arith.constant 0 : index
    %c0_99 = arith.constant 0 : index
    %290 = vector.load %arg16[%c0_98, %c0_99] : memref<32x64xbf16, #tpu.memory_space<vmem>>, vector<32x64xbf16>
    %cst_100 = arith.constant dense<0.000000e+00> : vector<2x64xf32>
    %291 = tpu.matmul %289, %290, %cst_100 {dimension_numbers = #tpu.dot_dimension_numbers<[1], [0], [0], [1], [0, 0, 1, 1], [], []>} : vector<2x32xbf16>, vector<32x64xbf16>, vector<2x64xf32> -> vector<2x64xf32>
    %c0_101 = arith.constant 0 : index
    %c0_102 = arith.constant 0 : index
    %292 = vector.load %arg17[%c0_101, %c0_102] : memref<2x64xf32, #tpu.memory_space<vmem>>, vector<2x64xf32>
    tpu.vector_store %arg17[%c0_101, %c0_102], %291 {strides = array<i32>} : memref<2x64xf32, #tpu.memory_space<vmem>>, vector<2x64xf32>,
    return
  }
  func.func @transform_0(%arg0: i32) -> (i32, i32) {
    %c0_i32 = arith.constant 0 : i32
    %c0_i32_0 = arith.constant 0 : i32
    %c0_i32_1 = arith.constant 0 : i32
    return %c0_i32, %c0_i32_0 : i32, i32
  }
  func.func @transform_1(%arg0: i32) -> (i32, i32) {
    %c0_i32 = arith.constant 0 : i32
    %c0_i32_0 = arith.constant 0 : i32
    %c0_i32_1 = arith.constant 0 : i32
    return %c0_i32, %c0_i32_0 : i32, i32
  }
  func.func @transform_2(%arg0: i32) -> (i32, i32) {
    %c0_i32 = arith.constant 0 : i32
    %c0_i32_0 = arith.constant 0 : i32
    %c0_i32_1 = arith.constant 0 : i32
    return %c0_i32, %c0_i32_0 : i32, i32
  }
  func.func @transform_3(%arg0: i32) -> (i32, i32) {
    %c0_i32 = arith.constant 0 : i32
    %c0_i32_0 = arith.constant 0 : i32
    %c0_i32_1 = arith.constant 0 : i32
    return %c0_i32, %c0_i32_0 : i32, i32
  }
  func.func @transform_4(%arg0: i32) -> (i32, i32) {
    %c0_i32 = arith.constant 0 : i32
    %c0_i32_0 = arith.constant 0 : i32
    %c0_i32_1 = arith.constant 0 : i32
    return %c0_i32, %c0_i32_0 : i32, i32
  }
  func.func @transform_5(%arg0: i32) -> (i32, i32) {
    %c0_i32 = arith.constant 0 : i32
    %c0_i32_0 = arith.constant 0 : i32
    %c0_i32_1 = arith.constant 0 : i32
    return %c0_i32, %c0_i32_0 : i32, i32
  }
  func.func @transform_6(%arg0: i32) -> (i32, i32) {
    %c0_i32 = arith.constant 0 : i32
    %c0_i32_0 = arith.constant 0 : i32
    %c0_i32_1 = arith.constant 0 : i32
    return %c0_i32, %c0_i32_0 : i32, i32
  }
  func.func @transform_7(%arg0: i32) -> (i32, i32, i32) {
    %c0_i32 = arith.constant 0 : i32
    %c0_i32_0 = arith.constant 0 : i32
    %c0_i32_1 = arith.constant 0 : i32
    %c0_i32_2 = arith.constant 0 : i32
    return %c0_i32, %c0_i32_0, %c0_i32_1 : i32, i32, i32
  }
  func.func @transform_8(%arg0: i32) -> (i32, i32, i32) {
    %c0_i32 = arith.constant 0 : i32
    %c0_i32_0 = arith.constant 0 : i32
    %c0_i32_1 = arith.constant 0 : i32
    %c0_i32_2 = arith.constant 0 : i32
    return %c0_i32, %c0_i32_0, %c0_i32_1 : i32, i32, i32
  }
  func.func @transform_9(%arg0: i32) -> (i32, i32, i32) {
    %c0_i32 = arith.constant 0 : i32
    %c0_i32_0 = arith.constant 0 : i32
    %c0_i32_1 = arith.constant 0 : i32
    %c0_i32_2 = arith.constant 0 : i32
    return %c0_i32, %c0_i32_0, %c0_i32_1 : i32, i32, i32
  }
  func.func @transform_10(%arg0: i32) -> (i32, i32, i32) {
    %c0_i32 = arith.constant 0 : i32
    %c0_i32_0 = arith.constant 0 : i32
    %c0_i32_1 = arith.constant 0 : i32
    %c0_i32_2 = arith.constant 0 : i32
    return %c0_i32, %c0_i32_0, %c0_i32_1 : i32, i32, i32
  }
  func.func @transform_11(%arg0: i32) -> (i32, i32, i32) {
    %c0_i32 = arith.constant 0 : i32
    %c0_i32_0 = arith.constant 0 : i32
    %c0_i32_1 = arith.constant 0 : i32
    %c0_i32_2 = arith.constant 0 : i32
    return %c0_i32, %c0_i32_0, %c0_i32_1 : i32, i32, i32
  }
  func.func @transform_12(%arg0: i32) -> (i32, i32, i32) {
    %c0_i32 = arith.constant 0 : i32
    %c0_i32_0 = arith.constant 0 : i32
    %c0_i32_1 = arith.constant 0 : i32
    %c0_i32_2 = arith.constant 0 : i32
    return %c0_i32, %c0_i32_0, %c0_i32_1 : i32, i32, i32
  }
  func.func @transform_13(%arg0: i32) -> (i32, i32, i32) {
    %c0_i32 = arith.constant 0 : i32
    %c0_i32_0 = arith.constant 0 : i32
    %c0_i32_1 = arith.constant 0 : i32
    %c0_i32_2 = arith.constant 0 : i32
    return %c0_i32, %c0_i32_0, %c0_i32_1 : i32, i32, i32
  }
  func.func @transform_14(%arg0: i32) -> (i32, i32) {
    %c0_i32 = arith.constant 0 : i32
    %c0_i32_0 = arith.constant 0 : i32
    %c0_i32_1 = arith.constant 0 : i32
    return %c0_i32, %c0_i32_0 : i32, i32
  }
  func.func @transform_15(%arg0: i32) -> (i32, i32) {
    %c0_i32 = arith.constant 0 : i32
    %c0_i32_0 = arith.constant 0 : i32
    %c0_i32_1 = arith.constant 0 : i32
    return %c0_i32, %c0_i32_0 : i32, i32
  }
  func.func @transform_16(%arg0: i32) -> (i32, i32) {
    %c0_i32 = arith.constant 0 : i32
    %c0_i32_0 = arith.constant 0 : i32
    %c0_i32_1 = arith.constant 0 : i32
    return %c0_i32, %c0_i32_0 : i32, i32
  }
}

</mosaic_0001>

<bundles_post_ra>
// kernel: clip_encode_text.1
= control target key start
LH: loop header
LB: loop body
LE: loop exit
PB: predicated region body
PF: predicated region fallthrough
CT: control target
= control target key end

     0   :  { %s2226_s0 = inlined_call_operand.vmem [shape: f32[16,32], index: 0, kind: input, shape index: {}]   ;;  %s2227_s1 = inlined_call_operand.vmem [shape: f32[2,16], index: 1, kind: input, shape index: {}]   ;;  %s2228_s2 = inlined_call_operand.vmem [shape: f32[16,64], index: 2, kind: input, shape index: {}]   ;;  %s2229_s3 = inlined_call_operand.vmem [shape: bf16[64,16], index: 3, kind: input, shape index: {}]   ;;  %s2230_s4 = inlined_call_operand.vmem [shape: bf16[64,32], index: 4, kind: input, shape index: {}]   ;;  %s2231_s5 = inlined_call_operand.vmem [shape: bf16[64,4], index: 5, kind: input, shape index: {}]   ;;  %s2232_s6 = inlined_call_operand.vmem [shape: bf16[4,32], index: 6, kind: input, shape index: {}]   ;;  %s2233_s7 = inlined_call_operand.vmem [shape: f32[2,8,32], index: 7, kind: input, shape index: {}]   ;;  %s2234_s8 = inlined_call_operand.vmem [shape: bf16[2,32,96], index: 8, kind: input, shape index: {}]   ;;  %s2235_s9 = inlined_call_operand.vmem [shape: f32[2,1,96], index: 9, kind: input, shape index: {}]   ;;  %s2236_s10 = inlined_call_operand.vmem [shape: bf16[2,32,32], index: 10, kind: input, shape index: {}]   ;;  %s2237_s11 = inlined_call_operand.vmem [shape: bf16[2,32,128], index: 11, kind: input, shape index: {}]   ;;  %s2238_s12 = inlined_call_operand.vmem [shape: f32[2,1,128], index: 12, kind: input, shape index: {}]   ;;  %s2239_s13 = inlined_call_operand.vmem [shape: bf16[2,128,32], index: 13, kind: input, shape index: {}]   ;;  %s2240_s14 = inlined_call_operand.vmem [shape: f32[2,32], index: 14, kind: input, shape index: {}]   ;;  %s2241_s15 = inlined_call_operand.vmem [shape: bf16[32,64], index: 15, kind: input, shape index: {}]   ;;  %s2242_s16 = inlined_call_operand.hbm [shape: f32[2,64], index: 16, kind: output, shape index: {}]  }
   0x1   :  { %2244 = sst [smem:[#allocation5_spill]] %s2226_s0 }
   0x2   :  { %s2245_s23 = sld [smem:[#allocation5_spill]]  ;;  %vm85_vm0 = vcmask 261120  }
   0x8   :  { %v1810_v0 = vld [vmem:[%s2245_s23] sm:$0xff] }
   0x9   :  { %v86_v1 = vsel %vm85_vm0, %v1810_v0, 0.0 }
   0xa   :  { %87 = vadd.xlane.f32.xlu0 %v86_v1 }
   0xb   :  { %21 = vsyncpa [#allocation3], 0  ;;  %v1817_v2 = vld [vmem:[%s2245_s23 + $0x8] sm:$0xff]  ;;  %v1718_v4 = vmov 32.0   ;;  %v1589_v23 = vld [vmem:[%s2234_s8] sm:$0xff]  ;;  %s1719_s19 = smov 96  }
   0xc   :  { %v89_v3 = vsel %vm85_vm0, %v1817_v2, 0.0  ;;  %1646 = vrcp.f32 %v1718_v4  ;;  %v1590_v21 = vld [vmem:[%s2234_s8 + $0x8] sm:$0xff]  ;;  %v1840_v40 = vld [vmem:[%s2233_s7] sm:$0xff]  ;;  %s1720_s20 = smov 64   ;;  %vm206_vm8 = vcmask 130048   ;;  %v1875_v63 = vld [vmem:[%s2229_s3 + $0x10] sm:$0xff] }
   0xd   :  { %173 = vmatpush.bf16.msra.mxu0 %v1590_v21  ;;  %v137_v43 = vperm.slane %v1840_v40, 0  ;;  %v140_v48 = vperm.slane %v1840_v40, 1  ;;  %v1642_v54 = vld [vmem:[%s2235_s9] ss:$0 sm:$0xff]  ;;  %v1866_v62 = vld [vmem:[%s2229_s3 + $0x8] sm:$0xff]  ;;  %v1884_v1 = vld [vmem:[%s2229_s3 + $0x18] sm:$0xff] }
   0xe   :  { %v1857_v60 = vld [vmem:[%s2229_s3] sm:$0xff]  ;;  %v1637_v21 = vld [vmem:[%s2230_s4 + $0x18] sm:$0xff]   ;;  %vm373_vm9 = vcmask 523264   ;;  %vm447_vm10 = vcmask 1041408   ;;  %vm443_vm11 = vcmask 31744   ;;  %s1721_s17 = smov [#allocation2]  }
   0xf   :  { %s1357_s21 = sshll.u32 %s2242_s16, 4  ;;  %s1358_s21 = int_to_ptr.hbm [resolvable:$true] %s1357_s21 }
  0x11   :  { %174 = vmatpush.bf16.msra.mxu0 %v1589_v23  ;;  %v1902_v23 = vunpack.c.l.bf16 %v1637_v21 }
  0x12   :  { %90 = vadd.xlane.f32.xlu0 %v89_v3  ;;  %v1647_v5 = vpop.eup %1646 }
  0x13   :  { %v93_v6 = vmul.f32 32.0, %v1647_v5  ;;  %vm97_vm1 = vweird.f32 %v1647_v5 }
  0x15   :  { %v94_v7 = vsub.f32 1.0, %v93_v6 }
  0x17   :  { %v95_v8 = vmul.f32 %v1647_v5, %v94_v7 }
  0x19   :  { %v96_v9 = vadd.f32 %v1647_v5, %v95_v8 }
  0x1b   :  { %v1821_v10 = vsel %vm97_vm1, %v1647_v5, %v96_v9  ;;  %v1620_v5 = vld [vmem:[%s2230_s4] sm:$0xff]  }
  0x1c   :  { %v1893_v7 = vunpack.c.l.bf16 %v1620_v5  ;;  %v1895_v9 = vunpack.c.h.bf16 %v1620_v5  ;;  %v1935_v5 = vld [vmem:[%s2228_s2] sm:$0xff] }
  0x7d   :  { %v88_v11 = vpop.xlane.xlu0 %87 }
  0x7e   :  { %v99_v12 = vmul.f32 %v1821_v10, %v88_v11 }
  0x80   :  { %v101_v13 = vsub.f32 %v1810_v0, %v99_v12 }
  0x82   :  { %v103_v14 = vmul.f32 %v101_v13, %v101_v13 }
  0x84   :  { %v105_v15 = vsel %vm85_vm0, %v103_v14, 0.0 }
  0x85   :  { %106 = vadd.xlane.f32.xlu1 %v105_v15  ;;  %v91_v16 = vpop.xlane.xlu0 %90 }
  0x86   :  { %v100_v17 = vmul.f32 %v1821_v10, %v91_v16 }
  0x88   :  { %v102_v18 = vsub.f32 %v1817_v2, %v100_v17 }
  0x8a   :  { %v104_v19 = vmul.f32 %v102_v18, %v102_v18 }
  0x8c   :  { %v108_v20 = vsel %vm85_vm0, %v104_v19, 0.0 }
  0x8d   :  { %109 = vadd.xlane.f32.xlu1 %v108_v20 }
  0xf8   :  { %v107_v22 = vpop.xlane.xlu1 %106 }
  0xf9   :  { %v111_v24 = vmul.f32 %v107_v22, %v1821_v10 }
  0xfb   :  { %v113_v25 = vadd.f32 1e-05, %v111_v24 }
  0xfd   :  { %1648 = vrsqrt.f32 %v113_v25  ;;  %vm121_vm3 = vweird.f32 %v113_v25 }
 0x100   :  { %v110_v26 = vpop.xlane.xlu1 %109 }
 0x101   :  { %v112_v27 = vmul.f32 %v110_v26, %v1821_v10 }
 0x103   :  { %v1649_v28 = vpop.eup %1648  ;;  %v114_v29 = vadd.f32 1e-05, %v112_v27  ;;  %v1904_v27 = vunpack.c.h.bf16 %v1637_v21 }
 0x104   :  { %v116_v30 = vmul.f32 %v1649_v28, %v113_v25  ;;  %vm122_vm2 = vweird.f32 %v1649_v28 }
 0x105   :  { %1650 = vrsqrt.f32 %v114_v29  ;;  %vm123_vm4 = vmor %vm121_vm3, %vm122_vm2  ;;  %vm131_vm6 = vweird.f32 %v114_v29 }
 0x106   :  { %v117_v31 = vmul.f32 %v1649_v28, %v116_v30 }
 0x108   :  { %v118_v32 = vmul.f32 0.5, %v117_v31  ;;  %v1636_v31 = vld [vmem:[%s2230_s4 + $0x10] sm:$0xff]  }
 0x10a   :  { %v119_v33 = vsub.f32 1.5, %v118_v32  ;;  %v1909_v32 = vunpack.c.h.bf16 %v1636_v31 }
 0x10b   :  { %v1651_v34 = vpop.eup %1650 }
 0x10c   :  { %v120_v35 = vmul.f32 %v1649_v28, %v119_v33  ;;  %v126_v36 = vmul.f32 %v1651_v34, %v114_v29  ;;  %vm132_vm5 = vweird.f32 %v1651_v34 }
 0x10d   :  { %vm133_vm7 = vmor %vm131_vm6, %vm132_vm5 }
 0x10e   :  { %v127_v37 = vmul.f32 %v1651_v34, %v126_v36  ;;  %v124_v38 = vsel %vm123_vm4, %v1649_v28, %v120_v35  ;;  %v1913_v36 = vunpack.c.l.bf16 %v1636_v31 }
 0x10f   :  { %v135_v42 = vmul.f32 %v124_v38, %v101_v13 }
 0x110   :  { %v128_v39 = vmul.f32 0.5, %v127_v37 }
 0x111   :  { %v138_v47 = vmul.f32 %v137_v43, %v135_v42 }
 0x112   :  { %v129_v41 = vsub.f32 1.5, %v128_v39 }
 0x113   :  { %v141_v50 = vadd.f32 %v140_v48, %v138_v47 }
 0x114   :  { %v130_v44 = vmul.f32 %v1651_v34, %v129_v41 }
 0x116   :  { %v134_v45 = vsel %vm133_vm7, %v1651_v34, %v130_v44 }
 0x117   :  { %v136_v46 = vmul.f32 %v134_v45, %v102_v18  ;;  %v1635_v45 = vld [vmem:[%s2230_s4 + $0x8] sm:$0xff]  }
 0x119   :  { %v139_v49 = vmul.f32 %v137_v43, %v136_v46  ;;  %v1921_v46 = vunpack.c.h.bf16 %v1635_v45 }
 0x11b   :  { %v142_v51 = vadd.f32 %v140_v48, %v139_v49  ;;  %v1923_v49 = vunpack.c.l.bf16 %v1635_v45 }
 0x11d   :  { %v143_v52 = vpack.c.bf16 %v142_v51, %v141_v50 }
 0x11f   :  { %1374 = vmatmul.msk.bf16.vlgmr.msra.gmra.mxu0 %vm85_vm0, %v143_v52 }
 0x19c   :  { %v176_v53 = vpop.f32.mrf.mxu0 }
 0x19d   :  { %v177_v56 = vadd.f32 %v1642_v54, %v176_v53 }
 0x1a4   :  { %v178_v55 = vpop.f32.mrf.mxu0 }
 0x1a5   :  { %v179_v57 = vadd.f32 %v1642_v54, %v178_v55 }
 0x1a7   :  { %v1848_v58 = vpack.c.bf16 %v179_v57, %v177_v56 }
 0x1a9   :  { %203 = vrot.lane.b32.xlu2 %v1848_v58, %s1719_s19 }
 0x1b1   :  { %284 = vrot.lane.b32.xlu2 %v1848_v58, %s1720_s20 }
 0x203   :  { %v204_v59 = vpop.permute.xlu2 %203 }
 0x204   :  { %226 = vmatpush.bf16.msra.mxu1 %v204_v59 }
 0x207   :  { %1391 = vmatmul.msk.bf16.vlgmr.msra.gmra.mxu1 %vm206_vm8, %v1857_v60 }
 0x20b   :  { %v285_v61 = vpop.permute.xlu2 %284 }
 0x20c   :  { %294 = vmatpush.bf16.msra.mxu2 %v285_v61 }
 0x20f   :  { %1395 = vmatmul.msk.bf16.vlgmr.msra.gmra.mxu2 %vm206_vm8, %v1857_v60 }
 0x217   :  { %1392 = vmatmul.msk.bf16.gmra.mxu1 %vm206_vm8, %v1866_v62 }
 0x21f   :  { %1396 = vmatmul.msk.bf16.gmra.mxu2 %vm206_vm8, %v1866_v62 }
 0x227   :  { %1393 = vmatmul.msk.bf16.gmra.mxu1 %vm206_vm8, %v1875_v63 }
 0x22f   :  { %1397 = vmatmul.msk.bf16.gmra.mxu2 %vm206_vm8, %v1875_v63 }
 0x237   :  { %1394 = vmatmul.msk.bf16.gmra.mxu1 %vm206_vm8, %v1884_v1 }
 0x23f   :  { %1398 = vmatmul.msk.bf16.gmra.mxu2 %vm206_vm8, %v1884_v1 }
 0x284   :  { %v228_v3 = vpop.f32.mrf.mxu1 }
 0x285   :  { %v248_v4 = vpack.c.bf16 %v228_v3, %v228_v3 }
 0x287   :  { %v256_v8 = vunpack.c.l.bf16 %v248_v4 }
 0x289   :  { %v272_v13 = vmul.f32 %v1893_v7, %v256_v8 }
 0x28c   :  { %v230_v6 = vpop.f32.mrf.mxu1 }
 0x28d   :  { %v249_v11 = vpack.c.bf16 %v230_v6, %v230_v6 }
 0x28f   :  { %v257_v12 = vunpack.c.l.bf16 %v249_v11 }
 0x291   :  { %v273_v14 = vmul.f32 %v1895_v9, %v257_v12 }
 0x292   :  { %v296_v57 = vpop.f32.mrf.mxu2 }
 0x293   :  { %v280_v15 = vpack.c.bf16 %v273_v14, %v272_v13  ;;  %v316_v31 = vpack.c.bf16 %v296_v57, %v296_v57 }
 0x294   :  { %v233_v16 = vpop.f32.mrf.mxu1 }
 0x295   :  { %v250_v43 = vpack.c.bf16 %v233_v16, %v233_v16  ;;  %v348_v56 = vsel %vm85_vm0, %v280_v15, 0 }
 0x297   :  { %v258_v50 = vunpack.c.l.bf16 %v250_v43 }
 0x299   :  { %v274_v53 = vmul.f32 %v1923_v49, %v258_v50 }
 0x29a   :  { %v298_v59 = vpop.f32.mrf.mxu2 }
 0x29c   :  { %v235_v17 = vpop.f32.mrf.mxu1 }
 0x29d   :  { %v251_v39 = vpack.c.bf16 %v235_v17, %v235_v17 }
 0x29f   :  { %v259_v47 = vunpack.c.l.bf16 %v251_v39 }
 0x2a1   :  { %v275_v51 = vmul.f32 %v1921_v46, %v259_v47 }
 0x2a2   :  { %v301_v61 = vpop.f32.mrf.mxu2 }
 0x2a3   :  { %v281_v54 = vpack.c.bf16 %v275_v51, %v274_v53  ;;  %v318_v21 = vpack.c.bf16 %v301_v61, %v301_v61  ;;  %v1957_v53 = vld [vmem:[%s2231_s5 + $0x18] sm:$0xff] }
 0x2a4   :  { %v238_v18 = vpop.f32.mrf.mxu1 }
 0x2a5   :  { %v252_v29 = vpack.c.bf16 %v238_v18, %v238_v18  ;;  %v351_v55 = vsel %vm85_vm0, %v281_v54, 0  ;;  %v1963_v54 = vld [vmem:[%s2231_s5 + $0x10] sm:$0xff] }
 0x2a7   :  { %v260_v37 = vunpack.c.l.bf16 %v252_v29 }
 0x2a9   :  { %v276_v44 = vmul.f32 %v1913_v36, %v260_v37 }
 0x2aa   :  { %v303_v3 = vpop.f32.mrf.mxu2 }
 0x2ac   :  { %v240_v19 = vpop.f32.mrf.mxu1 }
 0x2ad   :  { %v253_v25 = vpack.c.bf16 %v240_v19, %v240_v19 }
 0x2af   :  { %v261_v33 = vunpack.c.l.bf16 %v253_v25 }
 0x2b1   :  { %v277_v41 = vmul.f32 %v1909_v32, %v261_v33  ;;  %v317_v33 = vpack.c.bf16 %v298_v59, %v298_v59 }
 0x2b2   :  { %v306_v4 = vpop.f32.mrf.mxu2 }
 0x2b3   :  { %v282_v48 = vpack.c.bf16 %v277_v41, %v276_v44  ;;  %v320_v18 = vpack.c.bf16 %v306_v4, %v306_v4  ;;  %v325_v43 = vunpack.c.l.bf16 %v317_v33 }
 0x2b4   :  { %v243_v20 = vpop.f32.mrf.mxu1 }
 0x2b5   :  { %v254_v22 = vpack.c.bf16 %v243_v20, %v243_v20  ;;  %v354_v52 = vsel %vm85_vm0, %v282_v48, 0  ;;  %v328_v25 = vunpack.c.l.bf16 %v320_v18  ;;  %v333_v50 = vmul.f32 %v1895_v9, %v325_v43 }
 0x2b7   :  { %v262_v26 = vunpack.c.l.bf16 %v254_v22  ;;  %v336_v37 = vmul.f32 %v1913_v36, %v328_v25 }
 0x2b9   :  { %v278_v34 = vmul.f32 %v1902_v23, %v262_v26 }
 0x2ba   :  { %v308_v11 = vpop.f32.mrf.mxu2 }
 0x2bb   :  { %v321_v19 = vpack.c.bf16 %v308_v11, %v308_v11 }
 0x2bc   :  { %v245_v24 = vpop.f32.mrf.mxu1 }
 0x2bd   :  { %v255_v28 = vpack.c.bf16 %v245_v24, %v245_v24  ;;  %v319_v24 = vpack.c.bf16 %v303_v3, %v303_v3  ;;  %v329_v26 = vunpack.c.l.bf16 %v321_v19 }
 0x2bf   :  { %v263_v30 = vunpack.c.l.bf16 %v255_v28 }
 0x2c1   :  { %v279_v35 = vmul.f32 %v1904_v27, %v263_v30 }
 0x2c2   :  { %v311_v15 = vpop.f32.mrf.mxu2 }
 0x2c3   :  { %v283_v38 = vpack.c.bf16 %v279_v35, %v278_v34  ;;  %v322_v17 = vpack.c.bf16 %v311_v15, %v311_v15  ;;  %v326_v34 = vunpack.c.l.bf16 %v318_v21  ;;  %v327_v35 = vunpack.c.l.bf16 %v319_v24  ;;  %v81_v15 = vld [vmem:[%s2232_s6] sm:$0x3] }
 0x2c4   :  { %v1591_v21 = vld [vmem:[%s2236_s10] sm:$0xff] }
 0x2c5   :  { %v357_v42 = vsel %vm85_vm0, %v283_v38, 0  ;;  %v330_v20 = vunpack.c.l.bf16 %v322_v17  ;;  %v337_v38 = vmul.f32 %v1909_v32, %v329_v26  ;;  %v334_v44 = vmul.f32 %v1923_v49, %v326_v34 }
 0x2c6   :  { %363 = vmatpush.bf16.xpose.msra.mxu3 %v357_v42  ;;  %v324_v42 = vunpack.c.l.bf16 %v316_v31  ;;  %v335_v45 = vmul.f32 %v1921_v46, %v327_v35  ;;  %v505_v31 = vperm.slane %v1840_v40, 4 }
 0x2c7   :  { %v338_v29 = vmul.f32 %v1902_v23, %v330_v20  ;;  %v342_v47 = vpack.c.bf16 %v337_v38, %v336_v37  ;;  %v1592_v20 = vld [vmem:[%s2236_s10 + $0x8] sm:$0xff] }
 0x2c8   :  { %v332_v48 = vmul.f32 %v1893_v7, %v324_v42  ;;  %v341_v51 = vpack.c.bf16 %v335_v45, %v334_v44 }
 0x2ca   :  { %v313_v22 = vpop.f32.mrf.mxu2 }
 0x2cb   :  { %v323_v28 = vpack.c.bf16 %v313_v22, %v313_v22 }
 0x2cd   :  { %v331_v30 = vunpack.c.l.bf16 %v323_v28 }
 0x2ce   :  { %364 = vmatpush.bf16.xpose.msra.mxu3 %v354_v52  ;;  %v340_v52 = vpack.c.bf16 %v333_v50, %v332_v48 }
 0x2cf   :  { %v339_v39 = vmul.f32 %v1904_v27, %v331_v30 }
 0x2d1   :  { %v343_v41 = vpack.c.bf16 %v339_v39, %v338_v29 }
 0x2d3   :  { %394 = vmatpush.bf16.msrb.mxu0 %v343_v41 }
 0x2d6   :  { %365 = vmatpush.bf16.xpose.msra.mxu3 %v351_v55  ;;  %v1969_v55 = vld [vmem:[%s2231_s5 + $0x8] sm:$0xff] }
 0x2d7   :  { %395 = vmatpush.bf16.msrb.mxu0 %v342_v47 }
 0x2db   :  { %396 = vmatpush.bf16.msrb.mxu0 %v341_v51 }
 0x2de   :  { %366 = vmatpush.bf16.xpose.msra.mxu3 %v348_v56  ;;  %v1975_v56 = vld [vmem:[%s2231_s5] sm:$0xff]  ;;  %s1355_s5 = sshll.u32 %s1721_s17, 4  ;;  %s1356_s5 = int_to_ptr.vmem [resolvable:$true] %s1355_s5 }
 0x2df   :  { %397 = vmatpush.bf16.msrb.mxu0 %v340_v52 }
 0x2e3   :  { %432 = vmatpush.bf16.msra.mxu0 %v1957_v53 }
 0x2e5   :  { %1399 = vmatmul.msk.bf16.vlgmr.msra.gmra.mxu3 %vm85_vm0, %v1848_v58  ;;  %v1942_v58 = vld [vmem:[%s2228_s2 + $0x8] sm:$0xff] }
 0x2e7   :  { %433 = vmatpush.bf16.msra.mxu0 %v1963_v54 }
 0x2eb   :  { %434 = vmatpush.bf16.msra.mxu0 %v1969_v55 }
 0x2ef   :  { %435 = vmatpush.bf16.msra.mxu0 %v1975_v56 }
 0x368   :  { %v368_v6 = vpop.f32.mrf.mxu3 }
 0x369   :  { %v369_v8 = vadd.f32 %v368_v6, %v1935_v5 }
 0x36b   :  { %v374_v12 = vsel %vm373_vm9, %v369_v8, -inf }
 0x36c   :  { %375 = vmax.xlane.f32.xlu0 %v374_v12 }
 0x370   :  { %v370_v13 = vpop.f32.mrf.mxu3 }
 0x371   :  { %v371_v14 = vadd.f32 %v370_v13, %v1942_v58 }
 0x373   :  { %v377_v16 = vsel %vm373_vm9, %v371_v14, -inf }
 0x374   :  { %378 = vmax.xlane.f32.xlu1 %v377_v16  ;;  %v1983_v16 = vsel %vm447_vm10, %v81_v15, 0 }
 0x375   :  { %458 = vmatpush.bf16.msrb.mxu3 %v1983_v16 }
 0x3df   :  { %v376_v57 = vpop.xlane.xlu0 %375 }
 0x3e0   :  { %v380_v59 = vsub.f32 %v369_v8, %v376_v57  ;;  %v1594_v57 = vld [vmem:[%s2237_s11 + $0x8] sm:$0xff] }
 0x3e1   :  { %588 = vmatpush.bf16.msra.mxu3 %v1594_v57 }
 0x3e2   :  { %v382_v61 = vmul.f32 1.442695, %v380_v59 }
 0x3e4   :  { %1652 = vpow2.f32 %v382_v61 }
 0x3e7   :  { %v379_v3 = vpop.xlane.xlu1 %378 }
 0x3e8   :  { %v381_v4 = vsub.f32 %v371_v14, %v379_v3  ;;  %v1593_v3 = vld [vmem:[%s2237_s11] sm:$0xff] }
 0x3e9   :  { %589 = vmatpush.bf16.msra.mxu3 %v1593_v3 }
 0x3ea   :  { %v384_v6 = vmul.f32 1.442695, %v381_v4  ;;  %v1653_v11 = vpop.eup %1652 }
 0x3ec   :  { %1654 = vpow2.f32 %v384_v6 }
 0x3f2   :  { %v1655_v12 = vpop.eup %1654 }
 0x3f3   :  { %v386_v13 = vpack.c.bf16 %v1655_v12, %v1653_v11 }
 0x3f5   :  { %1400 = vmatmul.msk.bf16.vlgmr.msrb.gmra.mxu0 %vm373_vm9, %v386_v13 }
 0x3f6   :  { %495 = vmatpush.bf16.msrb.mxu0 %v1592_v20 }
 0x3fa   :  { %496 = vmatpush.bf16.msrb.mxu0 %v1591_v21 }
 0x405   :  { %1417 = vmatmul.msk.bf16.vlgmr.msra.gmra.mxu0 %vm373_vm9, %v386_v13 }
 0x472   :  { %v399_v8 = vpop.f32.mrf.mxu0 }
 0x47a   :  { %v401_v14 = vpop.f32.mrf.mxu0 }
 0x482   :  { %v437_v17 = vpop.f32.mrf.mxu0 }
 0x48a   :  { %v439_v18 = vpop.f32.mrf.mxu0 }
 0x48b   :  { %v442_v19 = vpack.c.bf16 %v439_v18, %v437_v17 }
 0x48d   :  { %1418 = vmatmul.msk.bf16.vlgmr.msrb.gmra.mxu3 %vm443_vm11, %v442_v19 }
 0x510   :  { %v460_v22 = vpop.f32.mrf.mxu3 }
 0x511   :  { %1656 = vrcp.f32 %v460_v22 }
 0x517   :  { %v1657_v25 = vpop.eup %1656 }
 0x518   :  { %v462_v24 = vpop.f32.mrf.mxu3  ;;  %v467_v28 = vmul.f32 %v1657_v25, %v399_v8 }
 0x519   :  { %1658 = vrcp.f32 %v462_v24 }
 0x51f   :  { %v1659_v26 = vpop.eup %1658 }
 0x520   :  { %v468_v29 = vmul.f32 %v1659_v26, %v401_v14  ;;  %v552_v26 = vperm.slane %v1840_v40, 2 }
 0x522   :  { %v469_v30 = vpack.c.bf16 %v468_v29, %v467_v28 }
 0x524   :  { %1427 = vmatmul.msk.bf16.vlgmr.msrb.gmra.mxu0 %vm85_vm0, %v469_v30 }
 0x5a1   :  { %v498_v33 = vpop.f32.mrf.mxu0 }
 0x5a2   :  { %v503_v34 = vadd.f32 %v498_v33, %v1810_v0 }
 0x5a4   :  { %v1996_v35 = vadd.f32 %v505_v31, %v503_v34 }
 0x5a6   :  { %v508_v37 = vsel %vm85_vm0, %v1996_v35, 0.0 }
 0x5a7   :  { %509 = vadd.xlane.f32.xlu2 %v508_v37 }
 0x5a9   :  { %v500_v38 = vpop.f32.mrf.mxu0 }
 0x5aa   :  { %v504_v39 = vadd.f32 %v500_v38, %v1817_v2 }
 0x5ac   :  { %v2001_v41 = vadd.f32 %v505_v31, %v504_v39  ;;  %v555_v31 = vperm.slane %v1840_v40, 3 }
 0x5ae   :  { %v511_v42 = vsel %vm85_vm0, %v2001_v41, 0.0 }
 0x5af   :  { %512 = vadd.xlane.f32.xlu0 %v511_v42 }
 0x61a   :  { %v510_v43 = vpop.xlane.xlu2 %509 }
 0x61b   :  { %v514_v44 = vmul.f32 %v510_v43, %v1821_v10  ;;  %v1602_v43 = vld [vmem:[%s2239_s13 + $0x38] sm:$0xff] }
 0x61c   :  { %679 = vmatpush.bf16.msrb.mxu1 %v1602_v43 }
 0x61d   :  { %v516_v0 = vsub.f32 %v1996_v35, %v514_v44  ;;  %v1601_v44 = vld [vmem:[%s2239_s13 + $0x30] sm:$0xff] }
 0x61f   :  { %v518_v45 = vmul.f32 %v516_v0, %v516_v0 }
 0x620   :  { %680 = vmatpush.bf16.msrb.mxu1 %v1601_v44 }
 0x621   :  { %v520_v47 = vsel %vm85_vm0, %v518_v45, 0.0  ;;  %v1599_v45 = vld [vmem:[%s2239_s13 + $0x20] sm:$0xff] }
 0x622   :  { %521 = vadd.xlane.f32.xlu1 %v520_v47  ;;  %v513_v48 = vpop.xlane.xlu0 %512  ;;  %v1598_v47 = vld [vmem:[%s2239_s13 + $0x18] sm:$0xff] }
 0x623   :  { %v515_v50 = vmul.f32 %v513_v48, %v1821_v10  ;;  %v1597_v48 = vld [vmem:[%s2239_s13 + $0x10] sm:$0xff] }
 0x625   :  { %v517_v2 = vsub.f32 %v2001_v41, %v515_v50  ;;  %v1596_v50 = vld [vmem:[%s2239_s13 + $0x8] sm:$0xff] }
 0x627   :  { %v519_v51 = vmul.f32 %v517_v2, %v517_v2 }
 0x629   :  { %v523_v52 = vsel %vm85_vm0, %v519_v51, 0.0  ;;  %v1595_v51 = vld [vmem:[%s2239_s13] sm:$0xff] }
 0x62a   :  { %524 = vadd.xlane.f32.xlu0 %v523_v52 }
 0x695   :  { %v522_v59 = vpop.xlane.xlu1 %521 }
 0x696   :  { %v526_v61 = vmul.f32 %v522_v59, %v1821_v10 }
 0x698   :  { %v528_v4 = vadd.f32 1e-05, %v526_v61 }
 0x69a   :  { %1660 = vrsqrt.f32 %v528_v4  ;;  %vm536_vm13 = vweird.f32 %v528_v4 }
 0x69d   :  { %v525_v6 = vpop.xlane.xlu0 %524 }
 0x69e   :  { %v527_v11 = vmul.f32 %v525_v6, %v1821_v10 }
 0x6a0   :  { %v1661_v12 = vpop.eup %1660  ;;  %v529_v13 = vadd.f32 1e-05, %v527_v11 }
 0x6a1   :  { %v531_v15 = vmul.f32 %v1661_v12, %v528_v4  ;;  %vm537_vm12 = vweird.f32 %v1661_v12 }
 0x6a2   :  { %1662 = vrsqrt.f32 %v529_v13  ;;  %vm538_vm14 = vmor %vm536_vm13, %vm537_vm12  ;;  %vm546_vm1 = vweird.f32 %v529_v13 }
 0x6a3   :  { %v532_v8 = vmul.f32 %v1661_v12, %v531_v15 }
 0x6a5   :  { %v533_v14 = vmul.f32 0.5, %v532_v8 }
 0x6a7   :  { %v534_v17 = vsub.f32 1.5, %v533_v14 }
 0x6a8   :  { %v1663_v18 = vpop.eup %1662 }
 0x6a9   :  { %v535_v19 = vmul.f32 %v1661_v12, %v534_v17  ;;  %v541_v20 = vmul.f32 %v1663_v18, %v529_v13  ;;  %vm547_vm15 = vweird.f32 %v1663_v18 }
 0x6aa   :  { %vm548_vm2 = vmor %vm546_vm1, %vm547_vm15 }
 0x6ab   :  { %v542_v21 = vmul.f32 %v1663_v18, %v541_v20  ;;  %v539_v22 = vsel %vm538_vm14, %v1661_v12, %v535_v19 }
 0x6ac   :  { %v550_v28 = vmul.f32 %v539_v22, %v516_v0  ;;  %v1600_v0 = vld [vmem:[%s2239_s13 + $0x28] sm:$0xff] }
 0x6ad   :  { %v543_v24 = vmul.f32 0.5, %v542_v21  ;;  %681 = vmatpush.bf16.msrb.mxu1 %v1600_v0 }
 0x6ae   :  { %v553_v33 = vmul.f32 %v552_v26, %v550_v28 }
 0x6af   :  { %v544_v25 = vsub.f32 1.5, %v543_v24 }
 0x6b0   :  { %v556_v38 = vadd.f32 %v555_v31, %v553_v33 }
 0x6b1   :  { %v545_v29 = vmul.f32 %v1663_v18, %v544_v25  ;;  %682 = vmatpush.bf16.msrb.mxu1 %v1599_v45 }
 0x6b3   :  { %v549_v30 = vsel %vm548_vm2, %v1663_v18, %v545_v29  ;;  %v695_v29 = vperm.slane %v1840_v40, 5 }
 0x6b4   :  { %v551_v34 = vmul.f32 %v549_v30, %v517_v2  ;;  %v1643_v2 = vld [vmem:[%s2238_s12] ss:$0 sm:$0xff] }
 0x6b5   :  { %683 = vmatpush.bf16.msrb.mxu1 %v1598_v47 }
 0x6b6   :  { %v554_v37 = vmul.f32 %v552_v26, %v551_v34 }
 0x6b8   :  { %v557_v39 = vadd.f32 %v555_v31, %v554_v37 }
 0x6b9   :  { %684 = vmatpush.bf16.msrb.mxu1 %v1597_v48 }
 0x6ba   :  { %v558_v42 = vpack.c.bf16 %v557_v39, %v556_v38 }
 0x6bc   :  { %1436 = vmatmul.msk.bf16.vlgmr.msra.gmra.mxu3 %vm85_vm0, %v558_v42 }
 0x6bd   :  { %685 = vmatpush.bf16.msrb.mxu1 %v1596_v50 }
 0x6c1   :  { %686 = vmatpush.bf16.msrb.mxu1 %v1595_v51 }
 0x73f   :  { %v591_v52 = vpop.f32.mrf.mxu3 }
 0x740   :  { %v592_v57 = vadd.f32 %v1643_v2, %v591_v52  ;;  %v1603_v52 = vld [vmem:[%s2234_s8 + $0x10] sm:$0xff] }
 0x742   :  { %v596_v59 = vmul.f32 %v592_v57, %v592_v57 }
 0x744   :  { %v598_v61 = vmul.f32 %v596_v59, %v592_v57 }
 0x746   :  { %v600_v3 = vmul.f32 0.044715, %v598_v61 }
 0x747   :  { %v593_v4 = vpop.f32.mrf.mxu3 }
 0x748   :  { %v602_v6 = vadd.f32 %v600_v3, %v592_v57  ;;  %v594_v11 = vadd.f32 %v1643_v2, %v593_v4  ;;  %v1604_v2 = vld [vmem:[%s2234_s8 + $0x18] sm:$0xff] }
 0x749   :  { %782 = vmatpush.bf16.msrb.mxu2 %v1604_v2 }
 0x74a   :  { %v604_v12 = vmul.f32 0.7978846, %v602_v6  ;;  %v597_v13 = vmul.f32 %v594_v11, %v594_v11 }
 0x74c   :  { %v599_v15 = vmul.f32 %v597_v13, %v594_v11  ;;  %1664 = vtanh.f32 %v604_v12 }
 0x74d   :  { %783 = vmatpush.bf16.msrb.mxu2 %v1603_v52 }
 0x74e   :  { %v601_v8 = vmul.f32 0.044715, %v599_v15 }
 0x750   :  { %v603_v14 = vadd.f32 %v601_v8, %v594_v11 }
 0x752   :  { %v605_v17 = vmul.f32 0.7978846, %v603_v14  ;;  %v1665_v18 = vpop.eup %1664 }
 0x753   :  { %v608_v19 = vadd.f32 1.0, %v1665_v18 }
 0x754   :  { %1666 = vtanh.f32 %v605_v17 }
 0x755   :  { %v610_v22 = vmul.f32 0.5, %v608_v19 }
 0x757   :  { %v612_v25 = vmul.f32 %v610_v22, %v592_v57 }
 0x75a   :  { %v1667_v20 = vpop.eup %1666 }
 0x75b   :  { %v609_v21 = vadd.f32 1.0, %v1667_v20 }
 0x75d   :  { %v611_v24 = vmul.f32 0.5, %v609_v21  ;;  %v2077_v21 = vld [vmem:[%s2233_s7 + $0x8] sm:$0xff] }
 0x75f   :  { %v613_v26 = vmul.f32 %v611_v24, %v594_v11 }
 0x761   :  { %v614_v28 = vpack.c.bf16 %v613_v26, %v612_v25  ;;  %v744_v25 = vperm.slane %v2077_v21, 0 }
 0x763   :  { %687 = vmatmul.bf16.vlgmr.msrb.gmra.mxu1 %v614_v28 }
 0x7e0   :  { %v688_v30 = vpop.f32.mrf.mxu1 }
 0x7e1   :  { %v693_v31 = vadd.f32 %v688_v30, %v1996_v35 }
 0x7e3   :  { %v2051_v33 = vadd.f32 %v695_v29, %v693_v31  ;;  %v747_v31 = vperm.slane %v2077_v21, 1 }
 0x7e5   :  { %v700_v34 = vsel %vm85_vm0, %v2051_v33, 0.0 }
 0x7e6   :  { %701 = vadd.xlane.f32.xlu1 %v700_v34 }
 0x7e8   :  { %v690_v37 = vpop.f32.mrf.mxu1 }
 0x7e9   :  { %v694_v38 = vadd.f32 %v690_v37, %v2001_v41 }
 0x7eb   :  { %v2056_v39 = vadd.f32 %v695_v29, %v694_v38 }
 0x7ed   :  { %v703_v42 = vsel %vm85_vm0, %v2056_v39, 0.0 }
 0x7ee   :  { %704 = vadd.xlane.f32.xlu0 %v703_v42 }
 0x859   :  { %v702_v43 = vpop.xlane.xlu1 %701 }
 0x85a   :  { %v706_v40 = vmul.f32 %v702_v43, %v1821_v10 }
 0x85c   :  { %v708_v35 = vsub.f32 %v2051_v33, %v706_v40  ;;  %v1644_v40 = vld [vmem:[%s2235_s9 + $0x1] ss:$0 sm:$0xff] }
 0x85e   :  { %v710_v44 = vmul.f32 %v708_v35, %v708_v35 }
 0x860   :  { %v712_v0 = vsel %vm85_vm0, %v710_v44, 0.0 }
 0x861   :  { %713 = vadd.xlane.f32.xlu1 %v712_v0  ;;  %v705_v45 = vpop.xlane.xlu0 %704 }
 0x862   :  { %v707_v47 = vmul.f32 %v705_v45, %v1821_v10 }
 0x864   :  { %v709_v41 = vsub.f32 %v2056_v39, %v707_v47 }
 0x866   :  { %v711_v48 = vmul.f32 %v709_v41, %v709_v41 }
 0x868   :  { %v715_v50 = vsel %vm85_vm0, %v711_v48, 0.0 }
 0x869   :  { %716 = vadd.xlane.f32.xlu0 %v715_v50 }
 0x8d4   :  { %v714_v51 = vpop.xlane.xlu1 %713 }
 0x8d5   :  { %v718_v57 = vmul.f32 %v714_v51, %v1821_v10 }
 0x8d7   :  { %v720_v59 = vadd.f32 1e-05, %v718_v57 }
 0x8d9   :  { %1668 = vrsqrt.f32 %v720_v59  ;;  %vm728_vm4 = vweird.f32 %v720_v59 }
 0x8dc   :  { %v717_v61 = vpop.xlane.xlu0 %716 }
 0x8dd   :  { %v719_v3 = vmul.f32 %v717_v61, %v1821_v10 }
 0x8df   :  { %v1669_v4 = vpop.eup %1668  ;;  %v721_v6 = vadd.f32 1e-05, %v719_v3 }
 0x8e0   :  { %v723_v11 = vmul.f32 %v1669_v4, %v720_v59  ;;  %vm729_vm3 = vweird.f32 %v1669_v4 }
 0x8e1   :  { %1670 = vrsqrt.f32 %v721_v6  ;;  %vm730_vm5 = vmor %vm728_vm4, %vm729_vm3  ;;  %vm738_vm7 = vweird.f32 %v721_v6 }
 0x8e2   :  { %v724_v12 = vmul.f32 %v1669_v4, %v723_v11 }
 0x8e4   :  { %v725_v13 = vmul.f32 0.5, %v724_v12 }
 0x8e6   :  { %v726_v15 = vsub.f32 1.5, %v725_v13 }
 0x8e7   :  { %v1671_v8 = vpop.eup %1670 }
 0x8e8   :  { %v727_v14 = vmul.f32 %v1669_v4, %v726_v15  ;;  %v733_v17 = vmul.f32 %v1671_v8, %v721_v6  ;;  %vm739_vm6 = vweird.f32 %v1671_v8 }
 0x8e9   :  { %vm740_vm10 = vmor %vm738_vm7, %vm739_vm6  ;;  %vm1348_vm7 = vcmask 517120  }
 0x8ea   :  { %v734_v18 = vmul.f32 %v1671_v8, %v733_v17  ;;  %v731_v19 = vsel %vm730_vm5, %v1669_v4, %v727_v14 }
 0x8eb   :  { %v742_v24 = vmul.f32 %v731_v19, %v708_v35 }
 0x8ec   :  { %v735_v20 = vmul.f32 0.5, %v734_v18 }
 0x8ed   :  { %v745_v30 = vmul.f32 %v744_v25, %v742_v24 }
 0x8ee   :  { %v736_v22 = vsub.f32 1.5, %v735_v20 }
 0x8ef   :  { %v748_v37 = vadd.f32 %v747_v31, %v745_v30 }
 0x8f0   :  { %v737_v26 = vmul.f32 %v1671_v8, %v736_v22 }
 0x8f2   :  { %v741_v28 = vsel %vm740_vm10, %v1671_v8, %v737_v26 }
 0x8f3   :  { %v743_v29 = vmul.f32 %v741_v28, %v709_v41 }
 0x8f5   :  { %v746_v34 = vmul.f32 %v744_v25, %v743_v29 }
 0x8f7   :  { %v749_v38 = vadd.f32 %v747_v31, %v746_v34 }
 0x8f9   :  { %v750_v42 = vpack.c.bf16 %v749_v38, %v748_v37 }
 0x8fb   :  { %1483 = vmatmul.msk.bf16.vlgmr.msrb.gmra.mxu2 %vm85_vm0, %v750_v42 }
 0x97e   :  { %v785_v43 = vpop.f32.mrf.mxu2 }
 0x97f   :  { %v786_v44 = vadd.f32 %v1644_v40, %v785_v43 }
 0x986   :  { %v787_v35 = vpop.f32.mrf.mxu2 }
 0x987   :  { %v788_v0 = vadd.f32 %v1644_v40, %v787_v35 }
 0x989   :  { %v790_v45 = vpack.c.bf16 %v788_v0, %v786_v44 }
 0x98b   :  { %852 = vrot.lane.b32.xlu0 %v790_v45, %s1720_s20  ;;  %792 = vrot.lane.b32.xlu1 %v790_v45, %s1719_s19 }
 0x9fd   :  { %v853_v47 = vpop.permute.xlu0 %852  ;;  %v793_v41 = vpop.permute.xlu1 %792 }
 0x9fe   :  { %802 = vmatpush.bf16.msra.mxu0 %v793_v41  ;;  %862 = vmatpush.bf16.msrb.mxu3 %v853_v47 }
 0xa01   :  { %1484 = vmatmul.msk.bf16.vlgmr.msra.gmra.mxu0 %vm206_vm8, %v1857_v60  ;;  %1488 = vmatmul.msk.bf16.vlgmr.msrb.gmra.mxu3 %vm206_vm8, %v1857_v60 }
 0xa11   :  { %1485 = vmatmul.msk.bf16.gmra.mxu0 %vm206_vm8, %v1866_v62  ;;  %1489 = vmatmul.msk.bf16.gmra.mxu3 %vm206_vm8, %v1866_v62 }
 0xa21   :  { %1486 = vmatmul.msk.bf16.gmra.mxu0 %vm206_vm8, %v1875_v63  ;;  %1490 = vmatmul.msk.bf16.gmra.mxu3 %vm206_vm8, %v1875_v63 }
 0xa31   :  { %1487 = vmatmul.msk.bf16.gmra.mxu0 %vm206_vm8, %v1884_v1  ;;  %1491 = vmatmul.msk.bf16.gmra.mxu3 %vm206_vm8, %v1884_v1 }
 0xa7e   :  { %v804_v48 = vpop.f32.mrf.mxu0 }
 0xa7f   :  { %v824_v60 = vpack.c.bf16 %v804_v48, %v804_v48 }
 0xa81   :  { %v832_v2 = vunpack.c.l.bf16 %v824_v60 }
 0xa83   :  { %v840_v62 = vmul.f32 %v1893_v7, %v832_v2 }
 0xa84   :  { %v864_v44 = vpop.f32.mrf.mxu3 }
 0xa86   :  { %v806_v50 = vpop.f32.mrf.mxu0 }
 0xa87   :  { %v825_v51 = vpack.c.bf16 %v806_v50, %v806_v50 }
 0xa89   :  { %v833_v52 = vunpack.c.l.bf16 %v825_v51 }
 0xa8b   :  { %v841_v57 = vmul.f32 %v1895_v9, %v833_v52 }
 0xa8c   :  { %v866_v0 = vpop.f32.mrf.mxu3 }
 0xa8d   :  { %v848_v59 = vpack.c.bf16 %v841_v57, %v840_v62 }
 0xa8e   :  { %v809_v61 = vpop.f32.mrf.mxu0 }
 0xa8f   :  { %v826_v28 = vpack.c.bf16 %v809_v61, %v809_v61  ;;  %v916_v35 = vsel %vm85_vm0, %v848_v59, 0 }
 0xa91   :  { %v834_v34 = vunpack.c.l.bf16 %v826_v28 }
 0xa93   :  { %v842_v42 = vmul.f32 %v1923_v49, %v834_v34 }
 0xa94   :  { %v869_v47 = vpop.f32.mrf.mxu3 }
 0xa96   :  { %v811_v3 = vpop.f32.mrf.mxu0 }
 0xa97   :  { %v827_v24 = vpack.c.bf16 %v811_v3, %v811_v3 }
 0xa99   :  { %v835_v30 = vunpack.c.l.bf16 %v827_v24 }
 0xa9b   :  { %v843_v37 = vmul.f32 %v1921_v46, %v835_v30 }
 0xa9c   :  { %v871_v41 = vpop.f32.mrf.mxu3 }
 0xa9d   :  { %v849_v43 = vpack.c.bf16 %v843_v37, %v842_v42  ;;  %v1606_v42 = vld [vmem:[%s2236_s10 + $0x18] sm:$0xff] }
 0xa9e   :  { %v814_v63 = vpop.f32.mrf.mxu0 }
 0xa9f   :  { %v828_v8 = vpack.c.bf16 %v814_v63, %v814_v63  ;;  %v919_v40 = vsel %vm85_vm0, %v849_v43, 0  ;;  %v886_v63 = vpack.c.bf16 %v869_v47, %v869_v47  ;;  %v1605_v43 = vld [vmem:[%s2236_s10 + $0x10] sm:$0xff] }
 0xaa1   :  { %v836_v20 = vunpack.c.l.bf16 %v828_v8  ;;  %v885_v8 = vpack.c.bf16 %v866_v0, %v866_v0 }
 0xaa3   :  { %v844_v29 = vmul.f32 %v1913_v36, %v836_v20  ;;  %v893_v24 = vunpack.c.l.bf16 %v885_v8 }
 0xaa4   :  { %v874_v48 = vpop.f32.mrf.mxu3 }
 0xaa5   :  { %v888_v59 = vpack.c.bf16 %v874_v48, %v874_v48 }
 0xaa6   :  { %v816_v4 = vpop.f32.mrf.mxu0 }
 0xaa7   :  { %v829_v13 = vpack.c.bf16 %v816_v4, %v816_v4 }
 0xaa9   :  { %v837_v17 = vunpack.c.l.bf16 %v829_v13 }
 0xaab   :  { %v845_v25 = vmul.f32 %v1909_v32, %v837_v17 }
 0xaac   :  { %v876_v2 = vpop.f32.mrf.mxu3 }
 0xaad   :  { %v850_v31 = vpack.c.bf16 %v845_v25, %v844_v29  ;;  %v889_v61 = vpack.c.bf16 %v876_v2, %v876_v2  ;;  %v901_v29 = vmul.f32 %v1895_v9, %v893_v24 }
 0xaae   :  { %v819_v6 = vpop.f32.mrf.mxu0 }
 0xaaf   :  { %v830_v11 = vpack.c.bf16 %v819_v6, %v819_v6  ;;  %v922_v38 = vsel %vm85_vm0, %v850_v31, 0  ;;  %v887_v6 = vpack.c.bf16 %v871_v41, %v871_v41 }
 0xab1   :  { %v838_v1 = vunpack.c.l.bf16 %v830_v11  ;;  %v896_v11 = vunpack.c.l.bf16 %v888_v59 }
 0xab3   :  { %v846_v18 = vmul.f32 %v1902_v23, %v838_v1  ;;  %v904_v17 = vmul.f32 %v1913_v36, %v896_v11 }
 0xab4   :  { %v879_v57 = vpop.f32.mrf.mxu3 }
 0xab6   :  { %v821_v12 = vpop.f32.mrf.mxu0 }
 0xab7   :  { %v831_v15 = vpack.c.bf16 %v821_v12, %v821_v12 }
 0xab9   :  { %v839_v14 = vunpack.c.l.bf16 %v831_v15  ;;  %v884_v15 = vpack.c.bf16 %v864_v44, %v864_v44 }
 0xabb   :  { %v847_v19 = vmul.f32 %v1904_v27, %v839_v14  ;;  %v895_v14 = vunpack.c.l.bf16 %v887_v6 }
 0xabc   :  { %v881_v4 = vpop.f32.mrf.mxu3 }
 0xabd   :  { %v851_v22 = vpack.c.bf16 %v847_v19, %v846_v18  ;;  %v891_v12 = vpack.c.bf16 %v881_v4, %v881_v4 }
 0xabf   :  { %v925_v26 = vsel %vm85_vm0, %v851_v22, 0  ;;  %v899_v1 = vunpack.c.l.bf16 %v891_v12  ;;  %v892_v22 = vunpack.c.l.bf16 %v884_v15  ;;  %v1608_v12 = vld [vmem:[%s2237_s11 + $0x18] sm:$0xff]  ;;  %v1607_v15 = vld [vmem:[%s2237_s11 + $0x10] sm:$0xff] }
 0xac0   :  { %931 = vmatpush.bf16.xpose.msra.mxu1 %v925_v26  ;;  %v903_v26 = vmul.f32 %v1921_v46, %v895_v14 }
 0xac1   :  { %v907_v19 = vmul.f32 %v1904_v27, %v899_v1  ;;  %v900_v28 = vmul.f32 %v1893_v7, %v892_v22 }
 0xac3   :  { %v908_v36 = vpack.c.bf16 %v901_v29, %v900_v28 }
 0xac8   :  { %932 = vmatpush.bf16.xpose.msra.mxu1 %v922_v38 }
 0xad0   :  { %933 = vmatpush.bf16.xpose.msra.mxu1 %v919_v40 }
 0xad8   :  { %934 = vmatpush.bf16.xpose.msra.mxu1 %v916_v35 }
 0xadf   :  { %1492 = vmatmul.msk.bf16.vlgmr.msra.gmra.mxu1 %vm85_vm0, %v790_v45  ;;  %v890_v45 = vpack.c.bf16 %v879_v57, %v879_v57 }
 0xae0   :  { %996 = vmatpush.bf16.msrb.mxu1 %v1983_v16 }
 0xae1   :  { %v898_v3 = vunpack.c.l.bf16 %v890_v45 }
 0xae3   :  { %v906_v13 = vmul.f32 %v1902_v23, %v898_v3 }
 0xae4   :  { %1129 = vmatpush.bf16.msra.mxu1 %v1608_v12 }
 0xae5   :  { %v911_v20 = vpack.c.bf16 %v907_v19, %v906_v13 }
 0xae7   :  { %961 = vmatpush.bf16.msra.mxu2 %v911_v20 }
 0xae8   :  { %1130 = vmatpush.bf16.msra.mxu1 %v1607_v15 }
 0xb5c   :  { %v936_v60 = vpop.f32.mrf.mxu1 }
 0xb5d   :  { %v937_v50 = vadd.f32 %v936_v60, %v1935_v5  ;;  %v897_v5 = vunpack.c.l.bf16 %v889_v61  ;;  %v1044_v60 = vperm.slane %v2077_v21, 4 }
 0xb5f   :  { %v941_v51 = vsel %vm373_vm9, %v937_v50, -inf  ;;  %v905_v18 = vmul.f32 %v1909_v32, %v897_v5 }
 0xb60   :  { %942 = vmax.xlane.f32.xlu2 %v941_v51 }
 0xb61   :  { %v910_v23 = vpack.c.bf16 %v905_v18, %v904_v17 }
 0xb63   :  { %962 = vmatpush.bf16.msra.mxu2 %v910_v23 }
 0xb64   :  { %v938_v52 = vpop.f32.mrf.mxu1 }
 0xb65   :  { %v939_v62 = vadd.f32 %v938_v52, %v1942_v58  ;;  %v894_v58 = vunpack.c.l.bf16 %v886_v63 }
 0xb67   :  { %v944_v16 = vsel %vm373_vm9, %v939_v62, -inf  ;;  %v902_v25 = vmul.f32 %v1923_v49, %v894_v58 }
 0xb68   :  { %945 = vmax.xlane.f32.xlu2 %v944_v16 }
 0xb69   :  { %v909_v30 = vpack.c.bf16 %v903_v26, %v902_v25 }
 0xb6b   :  { %963 = vmatpush.bf16.msra.mxu2 %v909_v30 }
 0xb6f   :  { %964 = vmatpush.bf16.msra.mxu2 %v908_v36 }
 0xb73   :  { %975 = vmatpush.bf16.msrb.mxu2 %v1957_v53 }
 0xb77   :  { %976 = vmatpush.bf16.msrb.mxu2 %v1963_v54 }
 0xb7b   :  { %977 = vmatpush.bf16.msrb.mxu2 %v1969_v55 }
 0xb7f   :  { %978 = vmatpush.bf16.msrb.mxu2 %v1975_v56 }
 0xbd3   :  { %v943_v27 = vpop.xlane.xlu2 %942 }
 0xbd4   :  { %v947_v32 = vsub.f32 %v937_v50, %v943_v27  ;;  %v1091_v27 = vperm.slane %v2077_v21, 2 }
 0xbd6   :  { %v949_v46 = vmul.f32 1.442695, %v947_v32 }
 0xbd8   :  { %1672 = vpow2.f32 %v949_v46 }
 0xbdb   :  { %v946_v49 = vpop.xlane.xlu2 %945 }
 0xbdc   :  { %v948_v7 = vsub.f32 %v939_v62, %v946_v49 }
 0xbde   :  { %v951_v31 = vmul.f32 1.442695, %v948_v7  ;;  %v1673_v9 = vpop.eup %1672  ;;  %v1094_v7 = vperm.slane %v2077_v21, 3 }
 0xbe0   :  { %1674 = vpow2.f32 %v951_v31 }
 0xbe6   :  { %v1675_v34 = vpop.eup %1674 }
 0xbe7   :  { %v953_v37 = vpack.c.bf16 %v1675_v34, %v1673_v9 }
 0xbe9   :  { %1493 = vmatmul.msk.bf16.vlgmr.msra.gmra.mxu2 %vm373_vm9, %v953_v37 }
 0xbea   :  { %1034 = vmatpush.bf16.msra.mxu2 %v1606_v42  ;;  %v1613_v42 = vld [vmem:[%s2239_s13 + $0x60] sm:$0xff] }
 0xbee   :  { %1035 = vmatpush.bf16.msra.mxu2 %v1605_v43  ;;  %v1612_v43 = vld [vmem:[%s2239_s13 + $0x58] sm:$0xff] }
 0xbf9   :  { %1494 = vmatmul.msk.bf16.vlgmr.msrb.gmra.mxu2 %vm373_vm9, %v953_v37 }
 0xc6c   :  { %v966_v53 = vpop.f32.mrf.mxu2 }
 0xc74   :  { %v968_v54 = vpop.f32.mrf.mxu2 }
 0xc7c   :  { %v980_v55 = vpop.f32.mrf.mxu2 }
 0xc84   :  { %v982_v38 = vpop.f32.mrf.mxu2 }
 0xc85   :  { %v985_v56 = vpack.c.bf16 %v982_v38, %v980_v55  ;;  %v1616_v55 = vld [vmem:[%s2239_s13 + $0x78] sm:$0xff]  ;;  %v1615_v38 = vld [vmem:[%s2239_s13 + $0x70] sm:$0xff] }
 0xc86   :  { %1221 = vmatpush.bf16.msrb.mxu0 %v1616_v55  ;;  %v1240_v55 = vld [vmem:[%s2240_s14] sm:$0x3] }
 0xc87   :  { %1495 = vmatmul.msk.bf16.vlgmr.msrb.gmra.mxu1 %vm443_vm11, %v985_v56  ;;  %v1614_v56 = vld [vmem:[%s2239_s13 + $0x68] sm:$0xff] }
 0xc8a   :  { %1222 = vmatpush.bf16.msrb.mxu0 %v1615_v38 }
 0xc8e   :  { %1223 = vmatpush.bf16.msrb.mxu0 %v1614_v56 }
 0xc92   :  { %1224 = vmatpush.bf16.msrb.mxu0 %v1613_v42 }
 0xc96   :  { %1225 = vmatpush.bf16.msrb.mxu0 %v1612_v43  ;;  %v1285_v43 = vperm.slane %v1240_v55, 0 }
 0xd04   :  { %v998_v40 = vpop.f32.mrf.mxu1 }
 0xd05   :  { %1676 = vrcp.f32 %v998_v40  ;;  %v1611_v40 = vld [vmem:[%s2239_s13 + $0x50] sm:$0xff] }
 0xd06   :  { %1226 = vmatpush.bf16.msrb.mxu0 %v1611_v40 }
 0xd0b   :  { %v1677_v44 = vpop.eup %1676 }
 0xd0c   :  { %v1000_v35 = vpop.f32.mrf.mxu1  ;;  %v1005_v47 = vmul.f32 %v1677_v44, %v966_v53  ;;  %v1645_v44 = vld [vmem:[%s2238_s12 + $0x1] ss:$0 sm:$0xff] }
 0xd0d   :  { %1678 = vrcp.f32 %v1000_v35  ;;  %v1610_v35 = vld [vmem:[%s2239_s13 + $0x48] sm:$0xff] }
 0xd0e   :  { %1227 = vmatpush.bf16.msrb.mxu0 %v1610_v35 }
 0xd13   :  { %v1679_v0 = vpop.eup %1678 }
 0xd14   :  { %v1006_v41 = vmul.f32 %v1679_v0, %v968_v54  ;;  %v1609_v0 = vld [vmem:[%s2239_s13 + $0x40] sm:$0xff] }
 0xd15   :  { %1228 = vmatpush.bf16.msrb.mxu0 %v1609_v0 }
 0xd16   :  { %v1007_v48 = vpack.c.bf16 %v1006_v41, %v1005_v47 }
 0xd18   :  { %1508 = vmatmul.msk.bf16.vlgmr.msra.gmra.mxu2 %vm85_vm0, %v1007_v48 }
 0xd9b   :  { %v1037_v50 = vpop.f32.mrf.mxu2 }
 0xd9c   :  { %v1042_v2 = vadd.f32 %v1037_v50, %v2051_v33 }
 0xd9e   :  { %v2145_v51 = vadd.f32 %v1044_v60, %v1042_v2 }
 0xda0   :  { %v1047_v52 = vsel %vm85_vm0, %v2145_v51, 0.0 }
 0xda1   :  { %1048 = vadd.xlane.f32.xlu1 %v1047_v52 }
 0xda3   :  { %v1039_v62 = vpop.f32.mrf.mxu2 }
 0xda4   :  { %v1043_v57 = vadd.f32 %v1039_v62, %v2056_v39 }
 0xda6   :  { %v2150_v16 = vadd.f32 %v1044_v60, %v1043_v57 }
 0xda8   :  { %v1050_v45 = vsel %vm85_vm0, %v2150_v16, 0.0 }
 0xda9   :  { %1051 = vadd.xlane.f32.xlu2 %v1050_v45 }
 0xe14   :  { %v1049_v59 = vpop.xlane.xlu1 %1048 }
 0xe15   :  { %v1053_v61 = vmul.f32 %v1049_v59, %v1821_v10 }
 0xe17   :  { %v1055_v33 = vsub.f32 %v2145_v51, %v1053_v61 }
 0xe19   :  { %v1057_v3 = vmul.f32 %v1055_v33, %v1055_v33 }
 0xe1b   :  { %v1059_v63 = vsel %vm85_vm0, %v1057_v3, 0.0 }
 0xe1c   :  { %1060 = vadd.xlane.f32.xlu0 %v1059_v63  ;;  %v1052_v4 = vpop.xlane.xlu2 %1051 }
 0xe1d   :  { %v1054_v6 = vmul.f32 %v1052_v4, %v1821_v10 }
 0xe1f   :  { %v1056_v39 = vsub.f32 %v2150_v16, %v1054_v6 }
 0xe21   :  { %v1058_v11 = vmul.f32 %v1056_v39, %v1056_v39 }
 0xe23   :  { %v1062_v5 = vsel %vm85_vm0, %v1058_v11, 0.0 }
 0xe24   :  { %1063 = vadd.xlane.f32.xlu2 %v1062_v5 }
 0xe8f   :  { %v1061_v13 = vpop.xlane.xlu0 %1060 }
 0xe90   :  { %v1065_v1 = vmul.f32 %v1061_v13, %v1821_v10 }
 0xe92   :  { %v1067_v8 = vadd.f32 1e-05, %v1065_v1 }
 0xe94   :  { %1680 = vrsqrt.f32 %v1067_v8  ;;  %vm1075_vm11 = vweird.f32 %v1067_v8 }
 0xe97   :  { %v1064_v58 = vpop.xlane.xlu2 %1063 }
 0xe98   :  { %v1066_v14 = vmul.f32 %v1064_v58, %v1821_v10 }
 0xe9a   :  { %v1681_v17 = vpop.eup %1680  ;;  %v1068_v18 = vadd.f32 1e-05, %v1066_v14  ;;  %v1237_v14 = vperm.slane %v2077_v21, 5 }
 0xe9b   :  { %v1070_v19 = vmul.f32 %v1681_v17, %v1067_v8  ;;  %vm1076_vm9 = vweird.f32 %v1681_v17 }
 0xe9c   :  { %1682 = vrsqrt.f32 %v1068_v18  ;;  %vm1077_vm12 = vmor %vm1075_vm11, %vm1076_vm9  ;;  %vm1085_vm14 = vweird.f32 %v1068_v18 }
 0xe9d   :  { %v1071_v20 = vmul.f32 %v1681_v17, %v1070_v19 }
 0xe9f   :  { %v1072_v22 = vmul.f32 0.5, %v1071_v20 }
 0xea1   :  { %v1073_v24 = vsub.f32 1.5, %v1072_v22 }
 0xea2   :  { %v1683_v25 = vpop.eup %1682 }
 0xea3   :  { %v1074_v26 = vmul.f32 %v1681_v17, %v1073_v24  ;;  %v1080_v23 = vmul.f32 %v1683_v25, %v1068_v18  ;;  %vm1086_vm13 = vweird.f32 %v1683_v25 }
 0xea4   :  { %vm1087_vm15 = vmor %vm1085_vm14, %vm1086_vm13 }
 0xea5   :  { %v1081_v28 = vmul.f32 %v1683_v25, %v1080_v23  ;;  %v1078_v29 = vsel %vm1077_vm12, %v1681_v17, %v1074_v26 }
 0xea6   :  { %v1089_v32 = vmul.f32 %v1078_v29, %v1055_v33 }
 0xea7   :  { %v1082_v30 = vmul.f32 0.5, %v1081_v28 }
 0xea8   :  { %v1092_v31 = vmul.f32 %v1091_v27, %v1089_v32 }
 0xea9   :  { %v1083_v36 = vsub.f32 1.5, %v1082_v30 }
 0xeaa   :  { %v1095_v37 = vadd.f32 %v1094_v7, %v1092_v31 }
 0xeab   :  { %v1084_v46 = vmul.f32 %v1683_v25, %v1083_v36 }
 0xead   :  { %v1088_v49 = vsel %vm1087_vm15, %v1683_v25, %v1084_v46  ;;  %v1618_v46 = vld [vmem:[%s2241_s15 + $0x8] sm:$0xff] }
 0xeae   :  { %v1090_v9 = vmul.f32 %v1088_v49, %v1056_v39  ;;  %1341 = vmatpush.bf16.msrb.mxu2 %v1618_v46 }
 0xeb0   :  { %v1093_v34 = vmul.f32 %v1091_v27, %v1090_v9 }
 0xeb2   :  { %v1096_v53 = vadd.f32 %v1094_v7, %v1093_v34 }
 0xeb4   :  { %v1097_v54 = vpack.c.bf16 %v1096_v53, %v1095_v37 }
 0xeb6   :  { %1522 = vmatmul.msk.bf16.vlgmr.msra.gmra.mxu1 %vm85_vm0, %v1097_v54 }
 0xf33   :  { %v1132_v47 = vpop.f32.mrf.mxu1 }
 0xf34   :  { %v1133_v41 = vadd.f32 %v1645_v44, %v1132_v47 }
 0xf36   :  { %v1137_v48 = vmul.f32 %v1133_v41, %v1133_v41 }
 0xf38   :  { %v1139_v60 = vmul.f32 %v1137_v48, %v1133_v41 }
 0xf3a   :  { %v1141_v50 = vmul.f32 0.044715, %v1139_v60 }
 0xf3b   :  { %v1134_v2 = vpop.f32.mrf.mxu1 }
 0xf3c   :  { %v1143_v52 = vadd.f32 %v1141_v50, %v1133_v41  ;;  %v1135_v62 = vadd.f32 %v1645_v44, %v1134_v2  ;;  %v1288_v44 = vperm.slane %v1240_v55, 1 }
 0xf3e   :  { %v1145_v57 = vmul.f32 0.7978846, %v1143_v52  ;;  %v1138_v45 = vmul.f32 %v1135_v62, %v1135_v62 }
 0xf40   :  { %v1140_v59 = vmul.f32 %v1138_v45, %v1135_v62  ;;  %1684 = vtanh.f32 %v1145_v57  ;;  %v1291_v57 = vld [vmem:[%s2227_s1] sm:$0x3] }
 0xf41   :  { %v1617_v45 = vld [vmem:[%s2241_s15] sm:$0xff] }
 0xf42   :  { %v1142_v61 = vmul.f32 0.044715, %v1140_v59  ;;  %1342 = vmatpush.bf16.msrb.mxu2 %v1617_v45 }
 0xf44   :  { %v1144_v33 = vadd.f32 %v1142_v61, %v1135_v62 }
 0xf46   :  { %v1146_v3 = vmul.f32 0.7978846, %v1144_v33  ;;  %v1685_v63 = vpop.eup %1684 }
 0xf47   :  { %v1149_v4 = vadd.f32 1.0, %v1685_v63 }
 0xf48   :  { %1686 = vtanh.f32 %v1146_v3 }
 0xf49   :  { %v1151_v39 = vmul.f32 0.5, %v1149_v4 }
 0xf4b   :  { %v1153_v12 = vmul.f32 %v1151_v39, %v1133_v41 }
 0xf4e   :  { %v1687_v6 = vpop.eup %1686 }
 0xf4f   :  { %v1150_v11 = vadd.f32 1.0, %v1687_v6 }
 0xf51   :  { %v1152_v5 = vmul.f32 0.5, %v1150_v11 }
 0xf53   :  { %v1154_v13 = vmul.f32 %v1152_v5, %v1135_v62 }
 0xf55   :  { %v1155_v1 = vpack.c.bf16 %v1154_v13, %v1153_v12 }
 0xf57   :  { %1229 = vmatmul.bf16.vlgmr.msrb.gmra.mxu0 %v1155_v1 }
 0xfd4   :  { %v1230_v15 = vpop.f32.mrf.mxu0 }
 0xfd5   :  { %v1235_v18 = vadd.f32 %v1230_v15, %v2145_v51 }
 0xfd7   :  { %v1238_v20 = vadd.f32 %v1237_v14, %v1235_v18 }
 0xfd9   :  { %v1241_v22 = vsel %vm85_vm0, %v1238_v20, 0.0 }
 0xfdc   :  { %v1232_v8 = vpop.f32.mrf.mxu0 }
 0xfdd   :  { %v1236_v58 = vadd.f32 %v1232_v8, %v2150_v16 }
 0xfdf   :  { %v1239_v17 = vadd.f32 %v1237_v14, %v1236_v58 }
 0xfe1   :  { %v1244_v19 = vsel %vm85_vm0, %v1239_v17, 0.0 }
 0xfe2   :  { %1245 = vadd.xlane.f32.xlu2 %v1244_v19 }
 0xfea   :  { %1242 = vadd.xlane.f32.xlu2 %v1241_v22 }
0x1055   :  { %v1246_v24 = vpop.xlane.xlu2 %1245 }
0x1056   :  { %v1248_v25 = vmul.f32 %v1246_v24, %v1821_v10 }
0x1058   :  { %v1250_v26 = vsub.f32 %v1239_v17, %v1248_v25 }
0x105a   :  { %v1252_v23 = vmul.f32 %v1250_v26, %v1250_v26 }
0x105c   :  { %v1256_v28 = vsel %vm85_vm0, %v1252_v23, 0.0 }
0x105d   :  { %1257 = vadd.xlane.f32.xlu2 %v1256_v28  ;;  %v1243_v16 = vpop.xlane.xlu2 %1242 }
0x105e   :  { %v1247_v21 = vmul.f32 %v1243_v16, %v1821_v10 }
0x1060   :  { %v1249_v29 = vsub.f32 %v1238_v20, %v1247_v21 }
0x1062   :  { %v1251_v51 = vmul.f32 %v1249_v29, %v1249_v29 }
0x1064   :  { %v1253_v30 = vsel %vm85_vm0, %v1251_v51, 0.0 }
0x1065   :  { %1254 = vadd.xlane.f32.xlu2 %v1253_v30 }
0x10d0   :  { %v1258_v36 = vpop.xlane.xlu2 %1257 }
0x10d1   :  { %v1260_v27 = vmul.f32 %v1258_v36, %v1821_v10 }
0x10d3   :  { %v1262_v32 = vadd.f32 1e-05, %v1260_v27 }
0x10d5   :  { %1688 = vrsqrt.f32 %v1262_v32  ;;  %vm1279_vm2 = vweird.f32 %v1262_v32 }
0x10d8   :  { %v1255_v49 = vpop.xlane.xlu2 %1254 }
0x10d9   :  { %v1259_v7 = vmul.f32 %v1255_v49, %v1821_v10 }
0x10db   :  { %v1689_v31 = vpop.eup %1688  ;;  %v1261_v9 = vadd.f32 1e-05, %v1259_v7 }
0x10dc   :  { %v1274_v34 = vmul.f32 %v1689_v31, %v1262_v32  ;;  %vm1280_vm1 = vweird.f32 %v1689_v31 }
0x10dd   :  { %1690 = vrsqrt.f32 %v1261_v9  ;;  %vm1281_vm3 = vmor %vm1279_vm2, %vm1280_vm1  ;;  %vm1269_vm5 = vweird.f32 %v1261_v9 }
0x10de   :  { %v1275_v37 = vmul.f32 %v1689_v31, %v1274_v34 }
0x10e0   :  { %v1276_v53 = vmul.f32 0.5, %v1275_v37 }
0x10e2   :  { %v1277_v54 = vsub.f32 1.5, %v1276_v53 }
0x10e3   :  { %v1691_v38 = vpop.eup %1690 }
0x10e4   :  { %v1278_v56 = vmul.f32 %v1689_v31, %v1277_v54  ;;  %v1264_v42 = vmul.f32 %v1691_v38, %v1261_v9  ;;  %vm1270_vm4 = vweird.f32 %v1691_v38 }
0x10e5   :  { %vm1271_vm6 = vmor %vm1269_vm5, %vm1270_vm4 }
0x10e6   :  { %v1282_v40 = vsel %vm1281_vm3, %v1689_v31, %v1278_v56  ;;  %v1265_v10 = vmul.f32 %v1691_v38, %v1264_v42 }
0x10e7   :  { %v1284_v35 = vmul.f32 %v1282_v40, %v1250_v26 }
0x10e8   :  { %v1266_v0 = vmul.f32 0.5, %v1265_v10 }
0x10e9   :  { %v1287_v47 = vmul.f32 %v1285_v43, %v1284_v35 }
0x10ea   :  { %v1267_v41 = vsub.f32 1.5, %v1266_v0 }
0x10eb   :  { %v1290_v48 = vadd.f32 %v1288_v44, %v1287_v47 }
0x10ec   :  { %v1268_v60 = vmul.f32 %v1691_v38, %v1267_v41 }
0x10ed   :  { %1309 = vmatpush.msra.mxu3 %v1290_v48 }
0x10ee   :  { %v1272_v50 = vsel %vm1271_vm6, %v1691_v38, %v1268_v60 }
0x10ef   :  { %v1283_v2 = vmul.f32 %v1272_v50, %v1249_v29 }
0x10f1   :  { %v1286_v52 = vmul.f32 %v1285_v43, %v1283_v2 }
0x10f3   :  { %v1289_v62 = vadd.f32 %v1288_v44, %v1286_v52 }
0x10f5   :  { %1310 = vmatpush.msra.mxu3 %v1289_v62 }
0x10f6   :  { %1571 = vmatmul.msk.f32.vlgmr.msra.gmra.mxu3 %vm206_vm8, %v1291_v57 }
0x1179   :  { %v1312_v59 = vpop.f32.mrf.mxu3 }
0x117a   :  { %v1315_v61 = vpack.c.bf16 %v1312_v59, %v1312_v59 }
0x117c   :  { %1580 = vmatmul.msk.bf16.vlgmr.msrb.gmra.mxu2 %vm85_vm0, %v1315_v61 }
0x11ff   :  { %v1344_v33 = vpop.f32.mrf.mxu2 }
0x1200   :  { %1349 = vst.msk [vmem:[#allocation2] sm:$0x3] %vm1348_vm7, %v1344_v33 }
0x1201   :  { %1360 = dma.vmem_to_hbm [thread:$0]  %s1356_s5, 32, %s1358_s21, [#allocation3]  }
0x1207   :  { %v1346_v3 = vpop.f32.mrf.mxu2 }
0x1208   :  { %1716 = dma.done.wait [#allocation3], 32  }
0x1209   :  { %1717 = vsyncadd [#allocation3], 4294967264 }
0x120a   :  { %1365 = vsyncpa [#allocation3], 1 }

</bundles_post_ra>
